<compile_context>
chip_gen: v7x
topology: tpu7x:2x2x1
jax: 0.10.0
libtpu: 0.0.40
codegen_flags: <defaults>
</compile_context>

<pallas_src>
import functools

import jax
import jax.numpy as jnp
from jax.experimental import pallas as pl
from jax.experimental.pallas import tpu as pltpu

DEPTH = 4
EPS = 1e-5


# ----------------------------------------------------------------------------
# Kernel 1: fused BasicBlock = conv3x3('same') + bias + BatchNorm(batch stats)
#           + affine + ReLU, single program, lane-dense (C, flat_spatial) layout.
# ----------------------------------------------------------------------------
def _enc_level_kernel(x_ref, w_ref, b_ref, g_ref, bt_ref, m_ref, o_ref, *,
                      L, Wp, inv_count):
    # x_ref : (C, N*Hp*Wp)  zero-padded input, spatially flattened (lane-dense)
    # w_ref : (9, C, C)     w_ref[dy*3+dx][co, ci] = weight[co, ci, dy, dx]
    # b_ref, g_ref, bt_ref : (C, 1) bias / gamma / beta
    # m_ref : (1, L)        1.0 where a "wide" position maps to a real output pixel
    # o_ref : (C, L)        conv+BN+ReLU output in the wide layout
    C = x_ref.shape[0]
    acc = jnp.zeros((C, L), jnp.float32)
    for dy in range(3):
        for dx in range(3):
            t = dy * 3 + dx
            off = dy * Wp + dx
            tap = x_ref[:, off:off + L]                       # (C, L) shifted view
            acc = acc + jnp.dot(w_ref[t], tap,
                                preferred_element_type=jnp.float32)
    acc = acc + b_ref[...]                                    # per-channel bias

    v = m_ref[...]                                            # (1, L) validity mask
    mean = jnp.sum(acc * v, axis=1, keepdims=True) * inv_count
    d = (acc - mean) * v                                      # two-pass (stable) var
    var = jnp.sum(d * d, axis=1, keepdims=True) * inv_count
    scale = g_ref[...] * jax.lax.rsqrt(var + EPS)
    shift = bt_ref[...] - mean * scale
    o_ref[...] = jnp.maximum(acc * scale + shift, 0.0)


def basic_block(x_cnhw, w9, bias, gamma, beta):
    """Fused conv3x3('same') + BN(train batch stats) + ReLU on a (C, N, H, W) tensor."""
    C, N, H, W = x_cnhw.shape
    Hp, Wp = H + 2, W + 2
    Ltot = N * Hp * Wp
    L = Ltot - 2 * Wp - 2                  # largest tap shift is (dy=2, dx=2)

    xflat = jnp.pad(x_cnhw, ((0, 0), (0, 0), (1, 1), (1, 1))).reshape(C, Ltot)

    # which wide positions correspond to real output pixels (for the BN statistics)
    q = jnp.arange(L, dtype=jnp.int32)
    r = q % (Hp * Wp)
    valid = ((r < H * Wp) & ((r % Wp) < W)).astype(jnp.float32).reshape(1, L)

    kernel = functools.partial(_enc_level_kernel, L=L, Wp=Wp,
                               inv_count=1.0 / float(N * H * W))
    wide = pl.pallas_call(
        kernel,
        out_shape=jax.ShapeDtypeStruct((C, L), jnp.float32),
        grid=(1,),
        in_specs=[
            pl.BlockSpec((C, Ltot), lambda i: (0, 0)),
            pl.BlockSpec((9, C, C), lambda i: (0, 0, 0)),
            pl.BlockSpec((C, 1), lambda i: (0, 0)),
            pl.BlockSpec((C, 1), lambda i: (0, 0)),
            pl.BlockSpec((C, 1), lambda i: (0, 0)),
            pl.BlockSpec((1, L), lambda i: (0, 0)),
        ],
        out_specs=pl.BlockSpec((C, L), lambda i: (0, 0)),
        compiler_params=pltpu.CompilerParams(dimension_semantics=("arbitrary",)),
    )(xflat, w9, bias.reshape(C, 1), gamma.reshape(C, 1), beta.reshape(C, 1), valid)

    # un-widen: pad back to the padded-flat length, reshape, crop (tiny XLA copy)
    feat = jnp.pad(wide, ((0, 0), (0, Ltot - L))).reshape(C, N, Hp, Wp)[:, :, :H, :W]
    return feat


# ----------------------------------------------------------------------------
# Kernel 2: decoder, fused nearest-upsample 2x + skip add (lane-dense (C*N, HW))
# ----------------------------------------------------------------------------
def _upsample_add_kernel(c_ref, s_ref, idx_ref, o_ref, *, S):
    # c_ref : (C*N, S) coarse map, s_ref/o_ref : (C*N, T) skip / output, T = 4*S
    # idx_ref : (1, T) int32, source coarse index for every fine position
    if S == 1:
        o_ref[...] = s_ref[...] + c_ref[...]     # broadcast of the single coarse pixel
        return
    T = s_ref.shape[1]
    rows = jax.lax.broadcasted_iota(jnp.int32, (S, T), 0)
    expand = (rows == idx_ref[...]).astype(jnp.float32)      # exact 0/1 gather matrix
    o_ref[...] = s_ref[...] + jnp.dot(c_ref[...], expand,
                                      preferred_element_type=jnp.float32)


def upsample2x_add(coarse, skip):
    """out = nearest_upsample_2x(coarse) + skip, inputs in (C, N, h, w) layout."""
    C, N, hc, wc = coarse.shape
    H, W = 2 * hc, 2 * wc
    S, T = hc * wc, H * W
    p = jnp.arange(T, dtype=jnp.int32)
    src = (((p // W) // 2) * wc + ((p % W) // 2)).astype(jnp.int32).reshape(1, T)

    out = pl.pallas_call(
        functools.partial(_upsample_add_kernel, S=S),
        out_shape=jax.ShapeDtypeStruct((C * N, T), jnp.float32),
        grid=(1,),
        in_specs=[
            pl.BlockSpec((C * N, S), lambda i: (0, 0)),
            pl.BlockSpec((C * N, T), lambda i: (0, 0)),
            pl.BlockSpec((1, T), lambda i: (0, 0)),
        ],
        out_specs=pl.BlockSpec((C * N, T), lambda i: (0, 0)),
        compiler_params=pltpu.CompilerParams(dimension_semantics=("arbitrary",)),
    )(coarse.reshape(C * N, S), skip.reshape(C * N, T), src)
    return out.reshape(C, N, H, W)


# ----------------------------------------------------------------------------
# XLA glue (pure data movement / tiny window max; the skip tensor must hit HBM anyway)
# ----------------------------------------------------------------------------
def max_pool_2x2(x):
    *lead, H, W = x.shape
    return x.reshape(*lead, H // 2, 2, W // 2, 2).max(axis=(-3, -1))


# ----------------------------------------------------------------------------
# HourglassBlock forward
# ----------------------------------------------------------------------------
def hourglass_forward(x_nchw, params, depth=DEPTH):
    cur = jnp.transpose(x_nchw, (1, 0, 2, 3))    # (C, N, H, W): channels on sublanes
    skips = []
    for i in range(depth):
        feat = basic_block(cur, params["w9"][i], params["b"][i],
                           params["gamma"][i], params["beta"][i])
        skips.append(feat)
        cur = max_pool_2x2(feat)
    for i in reversed(range(depth)):
        cur = upsample2x_add(cur, skips[i])
    return jnp.transpose(cur, (1, 0, 2, 3))      # back to (N, C, H, W)


# ----------------------------------------------------------------------------
# Pure-JAX reference (numerical sanity check, mirrors the PyTorch module)
# ----------------------------------------------------------------------------
def reference_forward(x, params, depth=DEPTH):
    down = []
    cur = x
    for i in range(depth):
        y = jax.lax.conv_general_dilated(cur, params["w"][i], (1, 1), ((1, 1), (1, 1)),
                                         dimension_numbers=("NCHW", "OIHW", "NCHW"))
        y = y + params["b"][i][None, :, None, None]
        mean = y.mean(axis=(0, 2, 3))
        var = y.var(axis=(0, 2, 3))
        y = (y - mean[None, :, None, None]) * jax.lax.rsqrt(var + EPS)[None, :, None, None]
        y = y * params["gamma"][i][None, :, None, None] + params["beta"][i][None, :, None, None]
        y = jnp.maximum(y, 0.0)
        down.append(y)
        cur = max_pool_2x2(y)
    for i in reversed(range(depth)):
        cur = jnp.repeat(jnp.repeat(cur, 2, axis=2), 2, axis=3) + down[i]
    return cur


# ----------------------------------------------------------------------------
# Deterministic parameter init (shapes follow HourglassBlock.__init__)
# ----------------------------------------------------------------------------
def init_params(key, num_features, depth=DEPTH):
    ws, w9s, bs, gammas, betas = [], [], [], [], []
    for _ in range(depth):
        key, k1, k2, k3, k4 = jax.random.split(key, 5)
        w = 0.1 * jax.random.normal(k1, (num_features, num_features, 3, 3), jnp.float32)
        ws.append(w)
        # (9, Cout, Cin) with t = dy*3 + dx, w9[t] = w[:, :, dy, dx]
        w9s.append(jnp.transpose(w, (2, 3, 0, 1)).reshape(9, num_features, num_features))
        bs.append(0.1 * jax.random.normal(k2, (num_features,), jnp.float32))
        gammas.append(1.0 + 0.1 * jax.random.normal(k3, (num_features,), jnp.float32))
        betas.append(0.1 * jax.random.normal(k4, (num_features,), jnp.float32))
    return {"w": ws, "w9": w9s, "b": bs, "gamma": gammas, "beta": betas}


if __name__ == "__main__":
    N, C, H, W = 2, 8, 16, 16
    key = jax.random.PRNGKey(0)
    key, kx, kp = jax.random.split(key, 3)
    x = jax.random.normal(kx, (N, C, H, W), jnp.float32)
    params = init_params(kp, C, DEPTH)

    fwd = jax.jit(functools.partial(hourglass_forward, depth=DEPTH))
    out = jax.block_until_ready(fwd(x, params))

    ref = jax.block_until_ready(reference_forward(x, params))
    assert out.shape == (N, C, H, W), out.shape
    err = float(jnp.max(jnp.abs(out - ref)))
    assert jnp.allclose(out, ref, atol=2e-3, rtol=2e-3), err

    print("KERNEL_OK")
</pallas_src>

<mosaic_0001>
module attributes {stable_mosaic.version = 11 : i64} {
  func.func @_enc_level_kernel(%arg0: i32, %arg1: memref<8x648xf32, #tpu.memory_space<vmem>>, %arg2: memref<9x8x8xf32, #tpu.memory_space<vmem>>, %arg3: memref<8x1xf32, #tpu.memory_space<vmem>>, %arg4: memref<8x1xf32, #tpu.memory_space<vmem>>, %arg5: memref<8x1xf32, #tpu.memory_space<vmem>>, %arg6: memref<1x610xf32, #tpu.memory_space<vmem>>, %arg7: memref<8x610xf32, #tpu.memory_space<vmem>>) attributes {dimension_semantics = [#tpu.dimension_semantics<arbitrary>], iteration_bounds = array<i64: 1>, scalar_prefetch = 0 : i64, scratch_operands = 0 : i64, tpu.core_type = #tpu.core_type<tc>, window_params = [{pipeline_mode = #tpu.pipeline_mode<synchronous>, transform_indices = @transform_0, window_bounds = array<i64: 8, 648>}, {pipeline_mode = #tpu.pipeline_mode<synchronous>, transform_indices = @transform_1, window_bounds = array<i64: 9, 8, 8>}, {pipeline_mode = #tpu.pipeline_mode<synchronous>, transform_indices = @transform_2, window_bounds = array<i64: 8, 1>}, {pipeline_mode = #tpu.pipeline_mode<synchronous>, transform_indices = @transform_3, window_bounds = array<i64: 8, 1>}, {pipeline_mode = #tpu.pipeline_mode<synchronous>, transform_indices = @transform_4, window_bounds = array<i64: 8, 1>}, {pipeline_mode = #tpu.pipeline_mode<synchronous>, transform_indices = @transform_5, window_bounds = array<i64: 1, 610>}, {pipeline_mode = #tpu.pipeline_mode<synchronous>, transform_indices = @transform_6, window_bounds = array<i64: 8, 610>}]} {
    %cst = arith.constant 0.000000e+00 : f32
    %0 = vector.broadcast %cst : f32 to vector<8x610xf32>
    %c0 = arith.constant 0 : index
    %c0_0 = arith.constant 0 : index
    %1 = vector.load %arg1[%c0, %c0_0] : memref<8x648xf32, #tpu.memory_space<vmem>>, vector<8x610xf32>
    %c0_1 = arith.constant 0 : index
    %c0_2 = arith.constant 0 : index
    %c0_3 = arith.constant 0 : index
    %2 = vector.load %arg2[%c0_1, %c0_2, %c0_3] : memref<9x8x8xf32, #tpu.memory_space<vmem>>, vector<1x8x8xf32>
    %3 = vector.shape_cast %2 : vector<1x8x8xf32> to vector<8x8xf32>
    %cst_4 = arith.constant dense<0.000000e+00> : vector<8x610xf32>
    %4 = tpu.matmul %3, %1, %cst_4 {dimension_numbers = #tpu.dot_dimension_numbers<[1], [0], [0], [1], [0, 0, 1, 1], [], []>} : vector<8x8xf32>, vector<8x610xf32>, vector<8x610xf32> -> vector<8x610xf32>
    %5 = arith.addf %0, %4 : vector<8x610xf32>
    %c0_5 = arith.constant 0 : index
    %c1 = arith.constant 1 : index
    %6 = vector.load %arg1[%c0_5, %c1] : memref<8x648xf32, #tpu.memory_space<vmem>>, vector<8x610xf32>
    %c1_6 = arith.constant 1 : index
    %c0_7 = arith.constant 0 : index
    %c0_8 = arith.constant 0 : index
    %7 = vector.load %arg2[%c1_6, %c0_7, %c0_8] : memref<9x8x8xf32, #tpu.memory_space<vmem>>, vector<1x8x8xf32>
    %8 = vector.shape_cast %7 : vector<1x8x8xf32> to vector<8x8xf32>
    %cst_9 = arith.constant dense<0.000000e+00> : vector<8x610xf32>
    %9 = tpu.matmul %8, %6, %cst_9 {dimension_numbers = #tpu.dot_dimension_numbers<[1], [0], [0], [1], [0, 0, 1, 1], [], []>} : vector<8x8xf32>, vector<8x610xf32>, vector<8x610xf32> -> vector<8x610xf32>
    %10 = arith.addf %5, %9 : vector<8x610xf32>
    %c0_10 = arith.constant 0 : index
    %c2 = arith.constant 2 : index
    %11 = vector.load %arg1[%c0_10, %c2] : memref<8x648xf32, #tpu.memory_space<vmem>>, vector<8x610xf32>
    %c2_11 = arith.constant 2 : index
    %c0_12 = arith.constant 0 : index
    %c0_13 = arith.constant 0 : index
    %12 = vector.load %arg2[%c2_11, %c0_12, %c0_13] : memref<9x8x8xf32, #tpu.memory_space<vmem>>, vector<1x8x8xf32>
    %13 = vector.shape_cast %12 : vector<1x8x8xf32> to vector<8x8xf32>
    %cst_14 = arith.constant dense<0.000000e+00> : vector<8x610xf32>
    %14 = tpu.matmul %13, %11, %cst_14 {dimension_numbers = #tpu.dot_dimension_numbers<[1], [0], [0], [1], [0, 0, 1, 1], [], []>} : vector<8x8xf32>, vector<8x610xf32>, vector<8x610xf32> -> vector<8x610xf32>
    %15 = arith.addf %10, %14 : vector<8x610xf32>
    %c0_15 = arith.constant 0 : index
    %c18 = arith.constant 18 : index
    %16 = vector.load %arg1[%c0_15, %c18] : memref<8x648xf32, #tpu.memory_space<vmem>>, vector<8x610xf32>
    %c3 = arith.constant 3 : index
    %c0_16 = arith.constant 0 : index
    %c0_17 = arith.constant 0 : index
    %17 = vector.load %arg2[%c3, %c0_16, %c0_17] : memref<9x8x8xf32, #tpu.memory_space<vmem>>, vector<1x8x8xf32>
    %18 = vector.shape_cast %17 : vector<1x8x8xf32> to vector<8x8xf32>
    %cst_18 = arith.constant dense<0.000000e+00> : vector<8x610xf32>
    %19 = tpu.matmul %18, %16, %cst_18 {dimension_numbers = #tpu.dot_dimension_numbers<[1], [0], [0], [1], [0, 0, 1, 1], [], []>} : vector<8x8xf32>, vector<8x610xf32>, vector<8x610xf32> -> vector<8x610xf32>
    %20 = arith.addf %15, %19 : vector<8x610xf32>
    %c0_19 = arith.constant 0 : index
    %c19 = arith.constant 19 : index
    %21 = vector.load %arg1[%c0_19, %c19] : memref<8x648xf32, #tpu.memory_space<vmem>>, vector<8x610xf32>
    %c4 = arith.constant 4 : index
    %c0_20 = arith.constant 0 : index
    %c0_21 = arith.constant 0 : index
    %22 = vector.load %arg2[%c4, %c0_20, %c0_21] : memref<9x8x8xf32, #tpu.memory_space<vmem>>, vector<1x8x8xf32>
    %23 = vector.shape_cast %22 : vector<1x8x8xf32> to vector<8x8xf32>
    %cst_22 = arith.constant dense<0.000000e+00> : vector<8x610xf32>
    %24 = tpu.matmul %23, %21, %cst_22 {dimension_numbers = #tpu.dot_dimension_numbers<[1], [0], [0], [1], [0, 0, 1, 1], [], []>} : vector<8x8xf32>, vector<8x610xf32>, vector<8x610xf32> -> vector<8x610xf32>
    %25 = arith.addf %20, %24 : vector<8x610xf32>
    %c0_23 = arith.constant 0 : index
    %c20 = arith.constant 20 : index
    %26 = vector.load %arg1[%c0_23, %c20] : memref<8x648xf32, #tpu.memory_space<vmem>>, vector<8x610xf32>
    %c5 = arith.constant 5 : index
    %c0_24 = arith.constant 0 : index
    %c0_25 = arith.constant 0 : index
    %27 = vector.load %arg2[%c5, %c0_24, %c0_25] : memref<9x8x8xf32, #tpu.memory_space<vmem>>, vector<1x8x8xf32>
    %28 = vector.shape_cast %27 : vector<1x8x8xf32> to vector<8x8xf32>
    %cst_26 = arith.constant dense<0.000000e+00> : vector<8x610xf32>
    %29 = tpu.matmul %28, %26, %cst_26 {dimension_numbers = #tpu.dot_dimension_numbers<[1], [0], [0], [1], [0, 0, 1, 1], [], []>} : vector<8x8xf32>, vector<8x610xf32>, vector<8x610xf32> -> vector<8x610xf32>
    %30 = arith.addf %25, %29 : vector<8x610xf32>
    %c0_27 = arith.constant 0 : index
    %c36 = arith.constant 36 : index
    %31 = vector.load %arg1[%c0_27, %c36] : memref<8x648xf32, #tpu.memory_space<vmem>>, vector<8x610xf32>
    %c6 = arith.constant 6 : index
    %c0_28 = arith.constant 0 : index
    %c0_29 = arith.constant 0 : index
    %32 = vector.load %arg2[%c6, %c0_28, %c0_29] : memref<9x8x8xf32, #tpu.memory_space<vmem>>, vector<1x8x8xf32>
    %33 = vector.shape_cast %32 : vector<1x8x8xf32> to vector<8x8xf32>
    %cst_30 = arith.constant dense<0.000000e+00> : vector<8x610xf32>
    %34 = tpu.matmul %33, %31, %cst_30 {dimension_numbers = #tpu.dot_dimension_numbers<[1], [0], [0], [1], [0, 0, 1, 1], [], []>} : vector<8x8xf32>, vector<8x610xf32>, vector<8x610xf32> -> vector<8x610xf32>
    %35 = arith.addf %30, %34 : vector<8x610xf32>
    %c0_31 = arith.constant 0 : index
    %c37 = arith.constant 37 : index
    %36 = vector.load %arg1[%c0_31, %c37] : memref<8x648xf32, #tpu.memory_space<vmem>>, vector<8x610xf32>
    %c7 = arith.constant 7 : index
    %c0_32 = arith.constant 0 : index
    %c0_33 = arith.constant 0 : index
    %37 = vector.load %arg2[%c7, %c0_32, %c0_33] : memref<9x8x8xf32, #tpu.memory_space<vmem>>, vector<1x8x8xf32>
    %38 = vector.shape_cast %37 : vector<1x8x8xf32> to vector<8x8xf32>
    %cst_34 = arith.constant dense<0.000000e+00> : vector<8x610xf32>
    %39 = tpu.matmul %38, %36, %cst_34 {dimension_numbers = #tpu.dot_dimension_numbers<[1], [0], [0], [1], [0, 0, 1, 1], [], []>} : vector<8x8xf32>, vector<8x610xf32>, vector<8x610xf32> -> vector<8x610xf32>
    %40 = arith.addf %35, %39 : vector<8x610xf32>
    %c0_35 = arith.constant 0 : index
    %c38 = arith.constant 38 : index
    %41 = vector.load %arg1[%c0_35, %c38] : memref<8x648xf32, #tpu.memory_space<vmem>>, vector<8x610xf32>
    %c8 = arith.constant 8 : index
    %c0_36 = arith.constant 0 : index
    %c0_37 = arith.constant 0 : index
    %42 = vector.load %arg2[%c8, %c0_36, %c0_37] : memref<9x8x8xf32, #tpu.memory_space<vmem>>, vector<1x8x8xf32>
    %43 = vector.shape_cast %42 : vector<1x8x8xf32> to vector<8x8xf32>
    %cst_38 = arith.constant dense<0.000000e+00> : vector<8x610xf32>
    %44 = tpu.matmul %43, %41, %cst_38 {dimension_numbers = #tpu.dot_dimension_numbers<[1], [0], [0], [1], [0, 0, 1, 1], [], []>} : vector<8x8xf32>, vector<8x610xf32>, vector<8x610xf32> -> vector<8x610xf32>
    %45 = arith.addf %40, %44 : vector<8x610xf32>
    %c0_39 = arith.constant 0 : index
    %c0_40 = arith.constant 0 : index
    %46 = vector.load %arg3[%c0_39, %c0_40] : memref<8x1xf32, #tpu.memory_space<vmem>>, vector<8x1xf32>
    %47 = vector.broadcast %46 : vector<8x1xf32> to vector<8x610xf32>
    %48 = arith.addf %45, %47 : vector<8x610xf32>
    %c0_41 = arith.constant 0 : index
    %c0_42 = arith.constant 0 : index
    %49 = vector.load %arg6[%c0_41, %c0_42] : memref<1x610xf32, #tpu.memory_space<vmem>>, vector<1x610xf32>
    %50 = vector.broadcast %49 : vector<1x610xf32> to vector<8x610xf32>
    %51 = arith.mulf %48, %50 : vector<8x610xf32>
    %cst_43 = arith.constant dense<0.000000e+00> : vector<8xf32>
    %52 = vector.multi_reduction <add>, %51, %cst_43 [1] : vector<8x610xf32> to vector<8xf32>
    %53 = vector.shape_cast %52 : vector<8xf32> to vector<8x1xf32>
    %cst_44 = arith.constant 0.001953125 : f32
    %54 = vector.broadcast %cst_44 : f32 to vector<8x1xf32>
    %55 = arith.mulf %53, %54 : vector<8x1xf32>
    %56 = vector.broadcast %55 : vector<8x1xf32> to vector<8x610xf32>
    %57 = arith.subf %48, %56 : vector<8x610xf32>
    %58 = vector.broadcast %49 : vector<1x610xf32> to vector<8x610xf32>
    %59 = arith.mulf %57, %58 : vector<8x610xf32>
    %60 = arith.mulf %59, %59 : vector<8x610xf32>
    %cst_45 = arith.constant dense<0.000000e+00> : vector<8xf32>
    %61 = vector.multi_reduction <add>, %60, %cst_45 [1] : vector<8x610xf32> to vector<8xf32>
    %62 = vector.shape_cast %61 : vector<8xf32> to vector<8x1xf32>
    %cst_46 = arith.constant 0.001953125 : f32
    %63 = vector.broadcast %cst_46 : f32 to vector<8x1xf32>
    %64 = arith.mulf %62, %63 : vector<8x1xf32>
    %c0_47 = arith.constant 0 : index
    %c0_48 = arith.constant 0 : index
    %65 = vector.load %arg4[%c0_47, %c0_48] : memref<8x1xf32, #tpu.memory_space<vmem>>, vector<8x1xf32>
    %cst_49 = arith.constant 9.99999974E-6 : f32
    %66 = vector.broadcast %cst_49 : f32 to vector<8x1xf32>
    %67 = arith.addf %64, %66 : vector<8x1xf32>
    %68 = math.rsqrt %67 : vector<8x1xf32>
    %69 = arith.mulf %65, %68 : vector<8x1xf32>
    %c0_50 = arith.constant 0 : index
    %c0_51 = arith.constant 0 : index
    %70 = vector.load %arg5[%c0_50, %c0_51] : memref<8x1xf32, #tpu.memory_space<vmem>>, vector<8x1xf32>
    %71 = arith.mulf %55, %69 : vector<8x1xf32>
    %72 = arith.subf %70, %71 : vector<8x1xf32>
    %73 = vector.broadcast %69 : vector<8x1xf32> to vector<8x610xf32>
    %74 = arith.mulf %48, %73 : vector<8x610xf32>
    %75 = vector.broadcast %72 : vector<8x1xf32> to vector<8x610xf32>
    %76 = arith.addf %74, %75 : vector<8x610xf32>
    %cst_52 = arith.constant 0.000000e+00 : f32
    %77 = vector.broadcast %cst_52 : f32 to vector<8x610xf32>
    %78 = arith.maximumf %76, %77 : vector<8x610xf32>
    %c0_53 = arith.constant 0 : index
    %c0_54 = arith.constant 0 : index
    %79 = vector.load %arg7[%c0_53, %c0_54] : memref<8x610xf32, #tpu.memory_space<vmem>>, vector<8x610xf32>
    tpu.vector_store %arg7[%c0_53, %c0_54], %78 {strides = array<i32>} : memref<8x610xf32, #tpu.memory_space<vmem>>, vector<8x610xf32>,
    return
  }
  func.func @transform_0(%arg0: i32) -> (i32, i32) {
    %c0_i32 = arith.constant 0 : i32
    %c0_i32_0 = arith.constant 0 : i32
    %c0_i32_1 = arith.constant 0 : i32
    return %c0_i32, %c0_i32_0 : i32, i32
  }
  func.func @transform_1(%arg0: i32) -> (i32, i32, i32) {
    %c0_i32 = arith.constant 0 : i32
    %c0_i32_0 = arith.constant 0 : i32
    %c0_i32_1 = arith.constant 0 : i32
    %c0_i32_2 = arith.constant 0 : i32
    return %c0_i32, %c0_i32_0, %c0_i32_1 : i32, i32, i32
  }
  func.func @transform_2(%arg0: i32) -> (i32, i32) {
    %c0_i32 = arith.constant 0 : i32
    %c0_i32_0 = arith.constant 0 : i32
    %c0_i32_1 = arith.constant 0 : i32
    return %c0_i32, %c0_i32_0 : i32, i32
  }
  func.func @transform_3(%arg0: i32) -> (i32, i32) {
    %c0_i32 = arith.constant 0 : i32
    %c0_i32_0 = arith.constant 0 : i32
    %c0_i32_1 = arith.constant 0 : i32
    return %c0_i32, %c0_i32_0 : i32, i32
  }
  func.func @transform_4(%arg0: i32) -> (i32, i32) {
    %c0_i32 = arith.constant 0 : i32
    %c0_i32_0 = arith.constant 0 : i32
    %c0_i32_1 = arith.constant 0 : i32
    return %c0_i32, %c0_i32_0 : i32, i32
  }
  func.func @transform_5(%arg0: i32) -> (i32, i32) {
    %c0_i32 = arith.constant 0 : i32
    %c0_i32_0 = arith.constant 0 : i32
    %c0_i32_1 = arith.constant 0 : i32
    return %c0_i32, %c0_i32_0 : i32, i32
  }
  func.func @transform_6(%arg0: i32) -> (i32, i32) {
    %c0_i32 = arith.constant 0 : i32
    %c0_i32_0 = arith.constant 0 : i32
    %c0_i32_1 = arith.constant 0 : i32
    return %c0_i32, %c0_i32_0 : i32, i32
  }
}

module attributes {stable_mosaic.version = 11 : i64} {
  func.func @_enc_level_kernel(%arg0: i32, %arg1: memref<8x200xf32, #tpu.memory_space<vmem>>, %arg2: memref<9x8x8xf32, #tpu.memory_space<vmem>>, %arg3: memref<8x1xf32, #tpu.memory_space<vmem>>, %arg4: memref<8x1xf32, #tpu.memory_space<vmem>>, %arg5: memref<8x1xf32, #tpu.memory_space<vmem>>, %arg6: memref<1x178xf32, #tpu.memory_space<vmem>>, %arg7: memref<8x178xf32, #tpu.memory_space<vmem>>) attributes {dimension_semantics = [#tpu.dimension_semantics<arbitrary>], iteration_bounds = array<i64: 1>, scalar_prefetch = 0 : i64, scratch_operands = 0 : i64, tpu.core_type = #tpu.core_type<tc>, window_params = [{pipeline_mode = #tpu.pipeline_mode<synchronous>, transform_indices = @transform_0, window_bounds = array<i64: 8, 200>}, {pipeline_mode = #tpu.pipeline_mode<synchronous>, transform_indices = @transform_1, window_bounds = array<i64: 9, 8, 8>}, {pipeline_mode = #tpu.pipeline_mode<synchronous>, transform_indices = @transform_2, window_bounds = array<i64: 8, 1>}, {pipeline_mode = #tpu.pipeline_mode<synchronous>, transform_indices = @transform_3, window_bounds = array<i64: 8, 1>}, {pipeline_mode = #tpu.pipeline_mode<synchronous>, transform_indices = @transform_4, window_bounds = array<i64: 8, 1>}, {pipeline_mode = #tpu.pipeline_mode<synchronous>, transform_indices = @transform_5, window_bounds = array<i64: 1, 178>}, {pipeline_mode = #tpu.pipeline_mode<synchronous>, transform_indices = @transform_6, window_bounds = array<i64: 8, 178>}]} {
    %cst = arith.constant 0.000000e+00 : f32
    %0 = vector.broadcast %cst : f32 to vector<8x178xf32>
    %c0 = arith.constant 0 : index
    %c0_0 = arith.constant 0 : index
    %1 = vector.load %arg1[%c0, %c0_0] : memref<8x200xf32, #tpu.memory_space<vmem>>, vector<8x178xf32>
    %c0_1 = arith.constant 0 : index
    %c0_2 = arith.constant 0 : index
    %c0_3 = arith.constant 0 : index
    %2 = vector.load %arg2[%c0_1, %c0_2, %c0_3] : memref<9x8x8xf32, #tpu.memory_space<vmem>>, vector<1x8x8xf32>
    %3 = vector.shape_cast %2 : vector<1x8x8xf32> to vector<8x8xf32>
    %cst_4 = arith.constant dense<0.000000e+00> : vector<8x178xf32>
    %4 = tpu.matmul %3, %1, %cst_4 {dimension_numbers = #tpu.dot_dimension_numbers<[1], [0], [0], [1], [0, 0, 1, 1], [], []>} : vector<8x8xf32>, vector<8x178xf32>, vector<8x178xf32> -> vector<8x178xf32>
    %5 = arith.addf %0, %4 : vector<8x178xf32>
    %c0_5 = arith.constant 0 : index
    %c1 = arith.constant 1 : index
    %6 = vector.load %arg1[%c0_5, %c1] : memref<8x200xf32, #tpu.memory_space<vmem>>, vector<8x178xf32>
    %c1_6 = arith.constant 1 : index
    %c0_7 = arith.constant 0 : index
    %c0_8 = arith.constant 0 : index
    %7 = vector.load %arg2[%c1_6, %c0_7, %c0_8] : memref<9x8x8xf32, #tpu.memory_space<vmem>>, vector<1x8x8xf32>
    %8 = vector.shape_cast %7 : vector<1x8x8xf32> to vector<8x8xf32>
    %cst_9 = arith.constant dense<0.000000e+00> : vector<8x178xf32>
    %9 = tpu.matmul %8, %6, %cst_9 {dimension_numbers = #tpu.dot_dimension_numbers<[1], [0], [0], [1], [0, 0, 1, 1], [], []>} : vector<8x8xf32>, vector<8x178xf32>, vector<8x178xf32> -> vector<8x178xf32>
    %10 = arith.addf %5, %9 : vector<8x178xf32>
    %c0_10 = arith.constant 0 : index
    %c2 = arith.constant 2 : index
    %11 = vector.load %arg1[%c0_10, %c2] : memref<8x200xf32, #tpu.memory_space<vmem>>, vector<8x178xf32>
    %c2_11 = arith.constant 2 : index
    %c0_12 = arith.constant 0 : index
    %c0_13 = arith.constant 0 : index
    %12 = vector.load %arg2[%c2_11, %c0_12, %c0_13] : memref<9x8x8xf32, #tpu.memory_space<vmem>>, vector<1x8x8xf32>
    %13 = vector.shape_cast %12 : vector<1x8x8xf32> to vector<8x8xf32>
    %cst_14 = arith.constant dense<0.000000e+00> : vector<8x178xf32>
    %14 = tpu.matmul %13, %11, %cst_14 {dimension_numbers = #tpu.dot_dimension_numbers<[1], [0], [0], [1], [0, 0, 1, 1], [], []>} : vector<8x8xf32>, vector<8x178xf32>, vector<8x178xf32> -> vector<8x178xf32>
    %15 = arith.addf %10, %14 : vector<8x178xf32>
    %c0_15 = arith.constant 0 : index
    %c10 = arith.constant 10 : index
    %16 = vector.load %arg1[%c0_15, %c10] : memref<8x200xf32, #tpu.memory_space<vmem>>, vector<8x178xf32>
    %c3 = arith.constant 3 : index
    %c0_16 = arith.constant 0 : index
    %c0_17 = arith.constant 0 : index
    %17 = vector.load %arg2[%c3, %c0_16, %c0_17] : memref<9x8x8xf32, #tpu.memory_space<vmem>>, vector<1x8x8xf32>
    %18 = vector.shape_cast %17 : vector<1x8x8xf32> to vector<8x8xf32>
    %cst_18 = arith.constant dense<0.000000e+00> : vector<8x178xf32>
    %19 = tpu.matmul %18, %16, %cst_18 {dimension_numbers = #tpu.dot_dimension_numbers<[1], [0], [0], [1], [0, 0, 1, 1], [], []>} : vector<8x8xf32>, vector<8x178xf32>, vector<8x178xf32> -> vector<8x178xf32>
    %20 = arith.addf %15, %19 : vector<8x178xf32>
    %c0_19 = arith.constant 0 : index
    %c11 = arith.constant 11 : index
    %21 = vector.load %arg1[%c0_19, %c11] : memref<8x200xf32, #tpu.memory_space<vmem>>, vector<8x178xf32>
    %c4 = arith.constant 4 : index
    %c0_20 = arith.constant 0 : index
    %c0_21 = arith.constant 0 : index
    %22 = vector.load %arg2[%c4, %c0_20, %c0_21] : memref<9x8x8xf32, #tpu.memory_space<vmem>>, vector<1x8x8xf32>
    %23 = vector.shape_cast %22 : vector<1x8x8xf32> to vector<8x8xf32>
    %cst_22 = arith.constant dense<0.000000e+00> : vector<8x178xf32>
    %24 = tpu.matmul %23, %21, %cst_22 {dimension_numbers = #tpu.dot_dimension_numbers<[1], [0], [0], [1], [0, 0, 1, 1], [], []>} : vector<8x8xf32>, vector<8x178xf32>, vector<8x178xf32> -> vector<8x178xf32>
    %25 = arith.addf %20, %24 : vector<8x178xf32>
    %c0_23 = arith.constant 0 : index
    %c12 = arith.constant 12 : index
    %26 = vector.load %arg1[%c0_23, %c12] : memref<8x200xf32, #tpu.memory_space<vmem>>, vector<8x178xf32>
    %c5 = arith.constant 5 : index
    %c0_24 = arith.constant 0 : index
    %c0_25 = arith.constant 0 : index
    %27 = vector.load %arg2[%c5, %c0_24, %c0_25] : memref<9x8x8xf32, #tpu.memory_space<vmem>>, vector<1x8x8xf32>
    %28 = vector.shape_cast %27 : vector<1x8x8xf32> to vector<8x8xf32>
    %cst_26 = arith.constant dense<0.000000e+00> : vector<8x178xf32>
    %29 = tpu.matmul %28, %26, %cst_26 {dimension_numbers = #tpu.dot_dimension_numbers<[1], [0], [0], [1], [0, 0, 1, 1], [], []>} : vector<8x8xf32>, vector<8x178xf32>, vector<8x178xf32> -> vector<8x178xf32>
    %30 = arith.addf %25, %29 : vector<8x178xf32>
    %c0_27 = arith.constant 0 : index
    %c20 = arith.constant 20 : index
    %31 = vector.load %arg1[%c0_27, %c20] : memref<8x200xf32, #tpu.memory_space<vmem>>, vector<8x178xf32>
    %c6 = arith.constant 6 : index
    %c0_28 = arith.constant 0 : index
    %c0_29 = arith.constant 0 : index
    %32 = vector.load %arg2[%c6, %c0_28, %c0_29] : memref<9x8x8xf32, #tpu.memory_space<vmem>>, vector<1x8x8xf32>
    %33 = vector.shape_cast %32 : vector<1x8x8xf32> to vector<8x8xf32>
    %cst_30 = arith.constant dense<0.000000e+00> : vector<8x178xf32>
    %34 = tpu.matmul %33, %31, %cst_30 {dimension_numbers = #tpu.dot_dimension_numbers<[1], [0], [0], [1], [0, 0, 1, 1], [], []>} : vector<8x8xf32>, vector<8x178xf32>, vector<8x178xf32> -> vector<8x178xf32>
    %35 = arith.addf %30, %34 : vector<8x178xf32>
    %c0_31 = arith.constant 0 : index
    %c21 = arith.constant 21 : index
    %36 = vector.load %arg1[%c0_31, %c21] : memref<8x200xf32, #tpu.memory_space<vmem>>, vector<8x178xf32>
    %c7 = arith.constant 7 : index
    %c0_32 = arith.constant 0 : index
    %c0_33 = arith.constant 0 : index
    %37 = vector.load %arg2[%c7, %c0_32, %c0_33] : memref<9x8x8xf32, #tpu.memory_space<vmem>>, vector<1x8x8xf32>
    %38 = vector.shape_cast %37 : vector<1x8x8xf32> to vector<8x8xf32>
    %cst_34 = arith.constant dense<0.000000e+00> : vector<8x178xf32>
    %39 = tpu.matmul %38, %36, %cst_34 {dimension_numbers = #tpu.dot_dimension_numbers<[1], [0], [0], [1], [0, 0, 1, 1], [], []>} : vector<8x8xf32>, vector<8x178xf32>, vector<8x178xf32> -> vector<8x178xf32>
    %40 = arith.addf %35, %39 : vector<8x178xf32>
    %c0_35 = arith.constant 0 : index
    %c22 = arith.constant 22 : index
    %41 = vector.load %arg1[%c0_35, %c22] : memref<8x200xf32, #tpu.memory_space<vmem>>, vector<8x178xf32>
    %c8 = arith.constant 8 : index
    %c0_36 = arith.constant 0 : index
    %c0_37 = arith.constant 0 : index
    %42 = vector.load %arg2[%c8, %c0_36, %c0_37] : memref<9x8x8xf32, #tpu.memory_space<vmem>>, vector<1x8x8xf32>
    %43 = vector.shape_cast %42 : vector<1x8x8xf32> to vector<8x8xf32>
    %cst_38 = arith.constant dense<0.000000e+00> : vector<8x178xf32>
    %44 = tpu.matmul %43, %41, %cst_38 {dimension_numbers = #tpu.dot_dimension_numbers<[1], [0], [0], [1], [0, 0, 1, 1], [], []>} : vector<8x8xf32>, vector<8x178xf32>, vector<8x178xf32> -> vector<8x178xf32>
    %45 = arith.addf %40, %44 : vector<8x178xf32>
    %c0_39 = arith.constant 0 : index
    %c0_40 = arith.constant 0 : index
    %46 = vector.load %arg3[%c0_39, %c0_40] : memref<8x1xf32, #tpu.memory_space<vmem>>, vector<8x1xf32>
    %47 = vector.broadcast %46 : vector<8x1xf32> to vector<8x178xf32>
    %48 = arith.addf %45, %47 : vector<8x178xf32>
    %c0_41 = arith.constant 0 : index
    %c0_42 = arith.constant 0 : index
    %49 = vector.load %arg6[%c0_41, %c0_42] : memref<1x178xf32, #tpu.memory_space<vmem>>, vector<1x178xf32>
    %50 = vector.broadcast %49 : vector<1x178xf32> to vector<8x178xf32>
    %51 = arith.mulf %48, %50 : vector<8x178xf32>
    %cst_43 = arith.constant dense<0.000000e+00> : vector<8xf32>
    %52 = vector.multi_reduction <add>, %51, %cst_43 [1] : vector<8x178xf32> to vector<8xf32>
    %53 = vector.shape_cast %52 : vector<8xf32> to vector<8x1xf32>
    %cst_44 = arith.constant 7.812500e-03 : f32
    %54 = vector.broadcast %cst_44 : f32 to vector<8x1xf32>
    %55 = arith.mulf %53, %54 : vector<8x1xf32>
    %56 = vector.broadcast %55 : vector<8x1xf32> to vector<8x178xf32>
    %57 = arith.subf %48, %56 : vector<8x178xf32>
    %58 = vector.broadcast %49 : vector<1x178xf32> to vector<8x178xf32>
    %59 = arith.mulf %57, %58 : vector<8x178xf32>
    %60 = arith.mulf %59, %59 : vector<8x178xf32>
    %cst_45 = arith.constant dense<0.000000e+00> : vector<8xf32>
    %61 = vector.multi_reduction <add>, %60, %cst_45 [1] : vector<8x178xf32> to vector<8xf32>
    %62 = vector.shape_cast %61 : vector<8xf32> to vector<8x1xf32>
    %cst_46 = arith.constant 7.812500e-03 : f32
    %63 = vector.broadcast %cst_46 : f32 to vector<8x1xf32>
    %64 = arith.mulf %62, %63 : vector<8x1xf32>
    %c0_47 = arith.constant 0 : index
    %c0_48 = arith.constant 0 : index
    %65 = vector.load %arg4[%c0_47, %c0_48] : memref<8x1xf32, #tpu.memory_space<vmem>>, vector<8x1xf32>
    %cst_49 = arith.constant 9.99999974E-6 : f32
    %66 = vector.broadcast %cst_49 : f32 to vector<8x1xf32>
    %67 = arith.addf %64, %66 : vector<8x1xf32>
    %68 = math.rsqrt %67 : vector<8x1xf32>
    %69 = arith.mulf %65, %68 : vector<8x1xf32>
    %c0_50 = arith.constant 0 : index
    %c0_51 = arith.constant 0 : index
    %70 = vector.load %arg5[%c0_50, %c0_51] : memref<8x1xf32, #tpu.memory_space<vmem>>, vector<8x1xf32>
    %71 = arith.mulf %55, %69 : vector<8x1xf32>
    %72 = arith.subf %70, %71 : vector<8x1xf32>
    %73 = vector.broadcast %69 : vector<8x1xf32> to vector<8x178xf32>
    %74 = arith.mulf %48, %73 : vector<8x178xf32>
    %75 = vector.broadcast %72 : vector<8x1xf32> to vector<8x178xf32>
    %76 = arith.addf %74, %75 : vector<8x178xf32>
    %cst_52 = arith.constant 0.000000e+00 : f32
    %77 = vector.broadcast %cst_52 : f32 to vector<8x178xf32>
    %78 = arith.maximumf %76, %77 : vector<8x178xf32>
    %c0_53 = arith.constant 0 : index
    %c0_54 = arith.constant 0 : index
    %79 = vector.load %arg7[%c0_53, %c0_54] : memref<8x178xf32, #tpu.memory_space<vmem>>, vector<8x178xf32>
    tpu.vector_store %arg7[%c0_53, %c0_54], %78 {strides = array<i32>} : memref<8x178xf32, #tpu.memory_space<vmem>>, vector<8x178xf32>,
    return
  }
  func.func @transform_0(%arg0: i32) -> (i32, i32) {
    %c0_i32 = arith.constant 0 : i32
    %c0_i32_0 = arith.constant 0 : i32
    %c0_i32_1 = arith.constant 0 : i32
    return %c0_i32, %c0_i32_0 : i32, i32
  }
  func.func @transform_1(%arg0: i32) -> (i32, i32, i32) {
    %c0_i32 = arith.constant 0 : i32
    %c0_i32_0 = arith.constant 0 : i32
    %c0_i32_1 = arith.constant 0 : i32
    %c0_i32_2 = arith.constant 0 : i32
    return %c0_i32, %c0_i32_0, %c0_i32_1 : i32, i32, i32
  }
  func.func @transform_2(%arg0: i32) -> (i32, i32) {
    %c0_i32 = arith.constant 0 : i32
    %c0_i32_0 = arith.constant 0 : i32
    %c0_i32_1 = arith.constant 0 : i32
    return %c0_i32, %c0_i32_0 : i32, i32
  }
  func.func @transform_3(%arg0: i32) -> (i32, i32) {
    %c0_i32 = arith.constant 0 : i32
    %c0_i32_0 = arith.constant 0 : i32
    %c0_i32_1 = arith.constant 0 : i32
    return %c0_i32, %c0_i32_0 : i32, i32
  }
  func.func @transform_4(%arg0: i32) -> (i32, i32) {
    %c0_i32 = arith.constant 0 : i32
    %c0_i32_0 = arith.constant 0 : i32
    %c0_i32_1 = arith.constant 0 : i32
    return %c0_i32, %c0_i32_0 : i32, i32
  }
  func.func @transform_5(%arg0: i32) -> (i32, i32) {
    %c0_i32 = arith.constant 0 : i32
    %c0_i32_0 = arith.constant 0 : i32
    %c0_i32_1 = arith.constant 0 : i32
    return %c0_i32, %c0_i32_0 : i32, i32
  }
  func.func @transform_6(%arg0: i32) -> (i32, i32) {
    %c0_i32 = arith.constant 0 : i32
    %c0_i32_0 = arith.constant 0 : i32
    %c0_i32_1 = arith.constant 0 : i32
    return %c0_i32, %c0_i32_0 : i32, i32
  }
}

module attributes {stable_mosaic.version = 11 : i64} {
  func.func @_enc_level_kernel(%arg0: i32, %arg1: memref<8x72xf32, #tpu.memory_space<vmem>>, %arg2: memref<9x8x8xf32, #tpu.memory_space<vmem>>, %arg3: memref<8x1xf32, #tpu.memory_space<vmem>>, %arg4: memref<8x1xf32, #tpu.memory_space<vmem>>, %arg5: memref<8x1xf32, #tpu.memory_space<vmem>>, %arg6: memref<1x58xf32, #tpu.memory_space<vmem>>, %arg7: memref<8x58xf32, #tpu.memory_space<vmem>>) attributes {dimension_semantics = [#tpu.dimension_semantics<arbitrary>], iteration_bounds = array<i64: 1>, scalar_prefetch = 0 : i64, scratch_operands = 0 : i64, tpu.core_type = #tpu.core_type<tc>, window_params = [{pipeline_mode = #tpu.pipeline_mode<synchronous>, transform_indices = @transform_0, window_bounds = array<i64: 8, 72>}, {pipeline_mode = #tpu.pipeline_mode<synchronous>, transform_indices = @transform_1, window_bounds = array<i64: 9, 8, 8>}, {pipeline_mode = #tpu.pipeline_mode<synchronous>, transform_indices = @transform_2, window_bounds = array<i64: 8, 1>}, {pipeline_mode = #tpu.pipeline_mode<synchronous>, transform_indices = @transform_3, window_bounds = array<i64: 8, 1>}, {pipeline_mode = #tpu.pipeline_mode<synchronous>, transform_indices = @transform_4, window_bounds = array<i64: 8, 1>}, {pipeline_mode = #tpu.pipeline_mode<synchronous>, transform_indices = @transform_5, window_bounds = array<i64: 1, 58>}, {pipeline_mode = #tpu.pipeline_mode<synchronous>, transform_indices = @transform_6, window_bounds = array<i64: 8, 58>}]} {
    %cst = arith.constant 0.000000e+00 : f32
    %0 = vector.broadcast %cst : f32 to vector<8x58xf32>
    %c0 = arith.constant 0 : index
    %c0_0 = arith.constant 0 : index
    %1 = vector.load %arg1[%c0, %c0_0] : memref<8x72xf32, #tpu.memory_space<vmem>>, vector<8x58xf32>
    %c0_1 = arith.constant 0 : index
    %c0_2 = arith.constant 0 : index
    %c0_3 = arith.constant 0 : index
    %2 = vector.load %arg2[%c0_1, %c0_2, %c0_3] : memref<9x8x8xf32, #tpu.memory_space<vmem>>, vector<1x8x8xf32>
    %3 = vector.shape_cast %2 : vector<1x8x8xf32> to vector<8x8xf32>
    %cst_4 = arith.constant dense<0.000000e+00> : vector<8x58xf32>
    %4 = tpu.matmul %3, %1, %cst_4 {dimension_numbers = #tpu.dot_dimension_numbers<[1], [0], [0], [1], [0, 0, 1, 1], [], []>} : vector<8x8xf32>, vector<8x58xf32>, vector<8x58xf32> -> vector<8x58xf32>
    %5 = arith.addf %0, %4 : vector<8x58xf32>
    %c0_5 = arith.constant 0 : index
    %c1 = arith.constant 1 : index
    %6 = vector.load %arg1[%c0_5, %c1] : memref<8x72xf32, #tpu.memory_space<vmem>>, vector<8x58xf32>
    %c1_6 = arith.constant 1 : index
    %c0_7 = arith.constant 0 : index
    %c0_8 = arith.constant 0 : index
    %7 = vector.load %arg2[%c1_6, %c0_7, %c0_8] : memref<9x8x8xf32, #tpu.memory_space<vmem>>, vector<1x8x8xf32>
    %8 = vector.shape_cast %7 : vector<1x8x8xf32> to vector<8x8xf32>
    %cst_9 = arith.constant dense<0.000000e+00> : vector<8x58xf32>
    %9 = tpu.matmul %8, %6, %cst_9 {dimension_numbers = #tpu.dot_dimension_numbers<[1], [0], [0], [1], [0, 0, 1, 1], [], []>} : vector<8x8xf32>, vector<8x58xf32>, vector<8x58xf32> -> vector<8x58xf32>
    %10 = arith.addf %5, %9 : vector<8x58xf32>
    %c0_10 = arith.constant 0 : index
    %c2 = arith.constant 2 : index
    %11 = vector.load %arg1[%c0_10, %c2] : memref<8x72xf32, #tpu.memory_space<vmem>>, vector<8x58xf32>
    %c2_11 = arith.constant 2 : index
    %c0_12 = arith.constant 0 : index
    %c0_13 = arith.constant 0 : index
    %12 = vector.load %arg2[%c2_11, %c0_12, %c0_13] : memref<9x8x8xf32, #tpu.memory_space<vmem>>, vector<1x8x8xf32>
    %13 = vector.shape_cast %12 : vector<1x8x8xf32> to vector<8x8xf32>
    %cst_14 = arith.constant dense<0.000000e+00> : vector<8x58xf32>
    %14 = tpu.matmul %13, %11, %cst_14 {dimension_numbers = #tpu.dot_dimension_numbers<[1], [0], [0], [1], [0, 0, 1, 1], [], []>} : vector<8x8xf32>, vector<8x58xf32>, vector<8x58xf32> -> vector<8x58xf32>
    %15 = arith.addf %10, %14 : vector<8x58xf32>
    %c0_15 = arith.constant 0 : index
    %c6 = arith.constant 6 : index
    %16 = vector.load %arg1[%c0_15, %c6] : memref<8x72xf32, #tpu.memory_space<vmem>>, vector<8x58xf32>
    %c3 = arith.constant 3 : index
    %c0_16 = arith.constant 0 : index
    %c0_17 = arith.constant 0 : index
    %17 = vector.load %arg2[%c3, %c0_16, %c0_17] : memref<9x8x8xf32, #tpu.memory_space<vmem>>, vector<1x8x8xf32>
    %18 = vector.shape_cast %17 : vector<1x8x8xf32> to vector<8x8xf32>
    %cst_18 = arith.constant dense<0.000000e+00> : vector<8x58xf32>
    %19 = tpu.matmul %18, %16, %cst_18 {dimension_numbers = #tpu.dot_dimension_numbers<[1], [0], [0], [1], [0, 0, 1, 1], [], []>} : vector<8x8xf32>, vector<8x58xf32>, vector<8x58xf32> -> vector<8x58xf32>
    %20 = arith.addf %15, %19 : vector<8x58xf32>
    %c0_19 = arith.constant 0 : index
    %c7 = arith.constant 7 : index
    %21 = vector.load %arg1[%c0_19, %c7] : memref<8x72xf32, #tpu.memory_space<vmem>>, vector<8x58xf32>
    %c4 = arith.constant 4 : index
    %c0_20 = arith.constant 0 : index
    %c0_21 = arith.constant 0 : index
    %22 = vector.load %arg2[%c4, %c0_20, %c0_21] : memref<9x8x8xf32, #tpu.memory_space<vmem>>, vector<1x8x8xf32>
    %23 = vector.shape_cast %22 : vector<1x8x8xf32> to vector<8x8xf32>
    %cst_22 = arith.constant dense<0.000000e+00> : vector<8x58xf32>
    %24 = tpu.matmul %23, %21, %cst_22 {dimension_numbers = #tpu.dot_dimension_numbers<[1], [0], [0], [1], [0, 0, 1, 1], [], []>} : vector<8x8xf32>, vector<8x58xf32>, vector<8x58xf32> -> vector<8x58xf32>
    %25 = arith.addf %20, %24 : vector<8x58xf32>
    %c0_23 = arith.constant 0 : index
    %c8 = arith.constant 8 : index
    %26 = vector.load %arg1[%c0_23, %c8] : memref<8x72xf32, #tpu.memory_space<vmem>>, vector<8x58xf32>
    %c5 = arith.constant 5 : index
    %c0_24 = arith.constant 0 : index
    %c0_25 = arith.constant 0 : index
    %27 = vector.load %arg2[%c5, %c0_24, %c0_25] : memref<9x8x8xf32, #tpu.memory_space<vmem>>, vector<1x8x8xf32>
    %28 = vector.shape_cast %27 : vector<1x8x8xf32> to vector<8x8xf32>
    %cst_26 = arith.constant dense<0.000000e+00> : vector<8x58xf32>
    %29 = tpu.matmul %28, %26, %cst_26 {dimension_numbers = #tpu.dot_dimension_numbers<[1], [0], [0], [1], [0, 0, 1, 1], [], []>} : vector<8x8xf32>, vector<8x58xf32>, vector<8x58xf32> -> vector<8x58xf32>
    %30 = arith.addf %25, %29 : vector<8x58xf32>
    %c0_27 = arith.constant 0 : index
    %c12 = arith.constant 12 : index
    %31 = vector.load %arg1[%c0_27, %c12] : memref<8x72xf32, #tpu.memory_space<vmem>>, vector<8x58xf32>
    %c6_28 = arith.constant 6 : index
    %c0_29 = arith.constant 0 : index
    %c0_30 = arith.constant 0 : index
    %32 = vector.load %arg2[%c6_28, %c0_29, %c0_30] : memref<9x8x8xf32, #tpu.memory_space<vmem>>, vector<1x8x8xf32>
    %33 = vector.shape_cast %32 : vector<1x8x8xf32> to vector<8x8xf32>
    %cst_31 = arith.constant dense<0.000000e+00> : vector<8x58xf32>
    %34 = tpu.matmul %33, %31, %cst_31 {dimension_numbers = #tpu.dot_dimension_numbers<[1], [0], [0], [1], [0, 0, 1, 1], [], []>} : vector<8x8xf32>, vector<8x58xf32>, vector<8x58xf32> -> vector<8x58xf32>
    %35 = arith.addf %30, %34 : vector<8x58xf32>
    %c0_32 = arith.constant 0 : index
    %c13 = arith.constant 13 : index
    %36 = vector.load %arg1[%c0_32, %c13] : memref<8x72xf32, #tpu.memory_space<vmem>>, vector<8x58xf32>
    %c7_33 = arith.constant 7 : index
    %c0_34 = arith.constant 0 : index
    %c0_35 = arith.constant 0 : index
    %37 = vector.load %arg2[%c7_33, %c0_34, %c0_35] : memref<9x8x8xf32, #tpu.memory_space<vmem>>, vector<1x8x8xf32>
    %38 = vector.shape_cast %37 : vector<1x8x8xf32> to vector<8x8xf32>
    %cst_36 = arith.constant dense<0.000000e+00> : vector<8x58xf32>
    %39 = tpu.matmul %38, %36, %cst_36 {dimension_numbers = #tpu.dot_dimension_numbers<[1], [0], [0], [1], [0, 0, 1, 1], [], []>} : vector<8x8xf32>, vector<8x58xf32>, vector<8x58xf32> -> vector<8x58xf32>
    %40 = arith.addf %35, %39 : vector<8x58xf32>
    %c0_37 = arith.constant 0 : index
    %c14 = arith.constant 14 : index
    %41 = vector.load %arg1[%c0_37, %c14] : memref<8x72xf32, #tpu.memory_space<vmem>>, vector<8x58xf32>
    %c8_38 = arith.constant 8 : index
    %c0_39 = arith.constant 0 : index
    %c0_40 = arith.constant 0 : index
    %42 = vector.load %arg2[%c8_38, %c0_39, %c0_40] : memref<9x8x8xf32, #tpu.memory_space<vmem>>, vector<1x8x8xf32>
    %43 = vector.shape_cast %42 : vector<1x8x8xf32> to vector<8x8xf32>
    %cst_41 = arith.constant dense<0.000000e+00> : vector<8x58xf32>
    %44 = tpu.matmul %43, %41, %cst_41 {dimension_numbers = #tpu.dot_dimension_numbers<[1], [0], [0], [1], [0, 0, 1, 1], [], []>} : vector<8x8xf32>, vector<8x58xf32>, vector<8x58xf32> -> vector<8x58xf32>
    %45 = arith.addf %40, %44 : vector<8x58xf32>
    %c0_42 = arith.constant 0 : index
    %c0_43 = arith.constant 0 : index
    %46 = vector.load %arg3[%c0_42, %c0_43] : memref<8x1xf32, #tpu.memory_space<vmem>>, vector<8x1xf32>
    %47 = vector.broadcast %46 : vector<8x1xf32> to vector<8x58xf32>
    %48 = arith.addf %45, %47 : vector<8x58xf32>
    %c0_44 = arith.constant 0 : index
    %c0_45 = arith.constant 0 : index
    %49 = vector.load %arg6[%c0_44, %c0_45] : memref<1x58xf32, #tpu.memory_space<vmem>>, vector<1x58xf32>
    %50 = vector.broadcast %49 : vector<1x58xf32> to vector<8x58xf32>
    %51 = arith.mulf %48, %50 : vector<8x58xf32>
    %cst_46 = arith.constant dense<0.000000e+00> : vector<8xf32>
    %52 = vector.multi_reduction <add>, %51, %cst_46 [1] : vector<8x58xf32> to vector<8xf32>
    %53 = vector.shape_cast %52 : vector<8xf32> to vector<8x1xf32>
    %cst_47 = arith.constant 3.125000e-02 : f32
    %54 = vector.broadcast %cst_47 : f32 to vector<8x1xf32>
    %55 = arith.mulf %53, %54 : vector<8x1xf32>
    %56 = vector.broadcast %55 : vector<8x1xf32> to vector<8x58xf32>
    %57 = arith.subf %48, %56 : vector<8x58xf32>
    %58 = vector.broadcast %49 : vector<1x58xf32> to vector<8x58xf32>
    %59 = arith.mulf %57, %58 : vector<8x58xf32>
    %60 = arith.mulf %59, %59 : vector<8x58xf32>
    %cst_48 = arith.constant dense<0.000000e+00> : vector<8xf32>
    %61 = vector.multi_reduction <add>, %60, %cst_48 [1] : vector<8x58xf32> to vector<8xf32>
    %62 = vector.shape_cast %61 : vector<8xf32> to vector<8x1xf32>
    %cst_49 = arith.constant 3.125000e-02 : f32
    %63 = vector.broadcast %cst_49 : f32 to vector<8x1xf32>
    %64 = arith.mulf %62, %63 : vector<8x1xf32>
    %c0_50 = arith.constant 0 : index
    %c0_51 = arith.constant 0 : index
    %65 = vector.load %arg4[%c0_50, %c0_51] : memref<8x1xf32, #tpu.memory_space<vmem>>, vector<8x1xf32>
    %cst_52 = arith.constant 9.99999974E-6 : f32
    %66 = vector.broadcast %cst_52 : f32 to vector<8x1xf32>
    %67 = arith.addf %64, %66 : vector<8x1xf32>
    %68 = math.rsqrt %67 : vector<8x1xf32>
    %69 = arith.mulf %65, %68 : vector<8x1xf32>
    %c0_53 = arith.constant 0 : index
    %c0_54 = arith.constant 0 : index
    %70 = vector.load %arg5[%c0_53, %c0_54] : memref<8x1xf32, #tpu.memory_space<vmem>>, vector<8x1xf32>
    %71 = arith.mulf %55, %69 : vector<8x1xf32>
    %72 = arith.subf %70, %71 : vector<8x1xf32>
    %73 = vector.broadcast %69 : vector<8x1xf32> to vector<8x58xf32>
    %74 = arith.mulf %48, %73 : vector<8x58xf32>
    %75 = vector.broadcast %72 : vector<8x1xf32> to vector<8x58xf32>
    %76 = arith.addf %74, %75 : vector<8x58xf32>
    %cst_55 = arith.constant 0.000000e+00 : f32
    %77 = vector.broadcast %cst_55 : f32 to vector<8x58xf32>
    %78 = arith.maximumf %76, %77 : vector<8x58xf32>
    %c0_56 = arith.constant 0 : index
    %c0_57 = arith.constant 0 : index
    %79 = vector.load %arg7[%c0_56, %c0_57] : memref<8x58xf32, #tpu.memory_space<vmem>>, vector<8x58xf32>
    tpu.vector_store %arg7[%c0_56, %c0_57], %78 {strides = array<i32>} : memref<8x58xf32, #tpu.memory_space<vmem>>, vector<8x58xf32>,
    return
  }
  func.func @transform_0(%arg0: i32) -> (i32, i32) {
    %c0_i32 = arith.constant 0 : i32
    %c0_i32_0 = arith.constant 0 : i32
    %c0_i32_1 = arith.constant 0 : i32
    return %c0_i32, %c0_i32_0 : i32, i32
  }
  func.func @transform_1(%arg0: i32) -> (i32, i32, i32) {
    %c0_i32 = arith.constant 0 : i32
    %c0_i32_0 = arith.constant 0 : i32
    %c0_i32_1 = arith.constant 0 : i32
    %c0_i32_2 = arith.constant 0 : i32
    return %c0_i32, %c0_i32_0, %c0_i32_1 : i32, i32, i32
  }
  func.func @transform_2(%arg0: i32) -> (i32, i32) {
    %c0_i32 = arith.constant 0 : i32
    %c0_i32_0 = arith.constant 0 : i32
    %c0_i32_1 = arith.constant 0 : i32
    return %c0_i32, %c0_i32_0 : i32, i32
  }
  func.func @transform_3(%arg0: i32) -> (i32, i32) {
    %c0_i32 = arith.constant 0 : i32
    %c0_i32_0 = arith.constant 0 : i32
    %c0_i32_1 = arith.constant 0 : i32
    return %c0_i32, %c0_i32_0 : i32, i32
  }
  func.func @transform_4(%arg0: i32) -> (i32, i32) {
    %c0_i32 = arith.constant 0 : i32
    %c0_i32_0 = arith.constant 0 : i32
    %c0_i32_1 = arith.constant 0 : i32
    return %c0_i32, %c0_i32_0 : i32, i32
  }
  func.func @transform_5(%arg0: i32) -> (i32, i32) {
    %c0_i32 = arith.constant 0 : i32
    %c0_i32_0 = arith.constant 0 : i32
    %c0_i32_1 = arith.constant 0 : i32
    return %c0_i32, %c0_i32_0 : i32, i32
  }
  func.func @transform_6(%arg0: i32) -> (i32, i32) {
    %c0_i32 = arith.constant 0 : i32
    %c0_i32_0 = arith.constant 0 : i32
    %c0_i32_1 = arith.constant 0 : i32
    return %c0_i32, %c0_i32_0 : i32, i32
  }
}

module attributes {stable_mosaic.version = 11 : i64} {
  func.func @_enc_level_kernel(%arg0: i32, %arg1: memref<8x32xf32, #tpu.memory_space<vmem>>, %arg2: memref<9x8x8xf32, #tpu.memory_space<vmem>>, %arg3: memref<8x1xf32, #tpu.memory_space<vmem>>, %arg4: memref<8x1xf32, #tpu.memory_space<vmem>>, %arg5: memref<8x1xf32, #tpu.memory_space<vmem>>, %arg6: memref<1x22xf32, #tpu.memory_space<vmem>>, %arg7: memref<8x22xf32, #tpu.memory_space<vmem>>) attributes {dimension_semantics = [#tpu.dimension_semantics<arbitrary>], iteration_bounds = array<i64: 1>, scalar_prefetch = 0 : i64, scratch_operands = 0 : i64, tpu.core_type = #tpu.core_type<tc>, window_params = [{pipeline_mode = #tpu.pipeline_mode<synchronous>, transform_indices = @transform_0, window_bounds = array<i64: 8, 32>}, {pipeline_mode = #tpu.pipeline_mode<synchronous>, transform_indices = @transform_1, window_bounds = array<i64: 9, 8, 8>}, {pipeline_mode = #tpu.pipeline_mode<synchronous>, transform_indices = @transform_2, window_bounds = array<i64: 8, 1>}, {pipeline_mode = #tpu.pipeline_mode<synchronous>, transform_indices = @transform_3, window_bounds = array<i64: 8, 1>}, {pipeline_mode = #tpu.pipeline_mode<synchronous>, transform_indices = @transform_4, window_bounds = array<i64: 8, 1>}, {pipeline_mode = #tpu.pipeline_mode<synchronous>, transform_indices = @transform_5, window_bounds = array<i64: 1, 22>}, {pipeline_mode = #tpu.pipeline_mode<synchronous>, transform_indices = @transform_6, window_bounds = array<i64: 8, 22>}]} {
    %cst = arith.constant 0.000000e+00 : f32
    %0 = vector.broadcast %cst : f32 to vector<8x22xf32>
    %c0 = arith.constant 0 : index
    %c0_0 = arith.constant 0 : index
    %1 = vector.load %arg1[%c0, %c0_0] : memref<8x32xf32, #tpu.memory_space<vmem>>, vector<8x22xf32>
    %c0_1 = arith.constant 0 : index
    %c0_2 = arith.constant 0 : index
    %c0_3 = arith.constant 0 : index
    %2 = vector.load %arg2[%c0_1, %c0_2, %c0_3] : memref<9x8x8xf32, #tpu.memory_space<vmem>>, vector<1x8x8xf32>
    %3 = vector.shape_cast %2 : vector<1x8x8xf32> to vector<8x8xf32>
    %cst_4 = arith.constant dense<0.000000e+00> : vector<8x22xf32>
    %4 = tpu.matmul %3, %1, %cst_4 {dimension_numbers = #tpu.dot_dimension_numbers<[1], [0], [0], [1], [0, 0, 1, 1], [], []>} : vector<8x8xf32>, vector<8x22xf32>, vector<8x22xf32> -> vector<8x22xf32>
    %5 = arith.addf %0, %4 : vector<8x22xf32>
    %c0_5 = arith.constant 0 : index
    %c1 = arith.constant 1 : index
    %6 = vector.load %arg1[%c0_5, %c1] : memref<8x32xf32, #tpu.memory_space<vmem>>, vector<8x22xf32>
    %c1_6 = arith.constant 1 : index
    %c0_7 = arith.constant 0 : index
    %c0_8 = arith.constant 0 : index
    %7 = vector.load %arg2[%c1_6, %c0_7, %c0_8] : memref<9x8x8xf32, #tpu.memory_space<vmem>>, vector<1x8x8xf32>
    %8 = vector.shape_cast %7 : vector<1x8x8xf32> to vector<8x8xf32>
    %cst_9 = arith.constant dense<0.000000e+00> : vector<8x22xf32>
    %9 = tpu.matmul %8, %6, %cst_9 {dimension_numbers = #tpu.dot_dimension_numbers<[1], [0], [0], [1], [0, 0, 1, 1], [], []>} : vector<8x8xf32>, vector<8x22xf32>, vector<8x22xf32> -> vector<8x22xf32>
    %10 = arith.addf %5, %9 : vector<8x22xf32>
    %c0_10 = arith.constant 0 : index
    %c2 = arith.constant 2 : index
    %11 = vector.load %arg1[%c0_10, %c2] : memref<8x32xf32, #tpu.memory_space<vmem>>, vector<8x22xf32>
    %c2_11 = arith.constant 2 : index
    %c0_12 = arith.constant 0 : index
    %c0_13 = arith.constant 0 : index
    %12 = vector.load %arg2[%c2_11, %c0_12, %c0_13] : memref<9x8x8xf32, #tpu.memory_space<vmem>>, vector<1x8x8xf32>
    %13 = vector.shape_cast %12 : vector<1x8x8xf32> to vector<8x8xf32>
    %cst_14 = arith.constant dense<0.000000e+00> : vector<8x22xf32>
    %14 = tpu.matmul %13, %11, %cst_14 {dimension_numbers = #tpu.dot_dimension_numbers<[1], [0], [0], [1], [0, 0, 1, 1], [], []>} : vector<8x8xf32>, vector<8x22xf32>, vector<8x22xf32> -> vector<8x22xf32>
    %15 = arith.addf %10, %14 : vector<8x22xf32>
    %c0_15 = arith.constant 0 : index
    %c4 = arith.constant 4 : index
    %16 = vector.load %arg1[%c0_15, %c4] : memref<8x32xf32, #tpu.memory_space<vmem>>, vector<8x22xf32>
    %c3 = arith.constant 3 : index
    %c0_16 = arith.constant 0 : index
    %c0_17 = arith.constant 0 : index
    %17 = vector.load %arg2[%c3, %c0_16, %c0_17] : memref<9x8x8xf32, #tpu.memory_space<vmem>>, vector<1x8x8xf32>
    %18 = vector.shape_cast %17 : vector<1x8x8xf32> to vector<8x8xf32>
    %cst_18 = arith.constant dense<0.000000e+00> : vector<8x22xf32>
    %19 = tpu.matmul %18, %16, %cst_18 {dimension_numbers = #tpu.dot_dimension_numbers<[1], [0], [0], [1], [0, 0, 1, 1], [], []>} : vector<8x8xf32>, vector<8x22xf32>, vector<8x22xf32> -> vector<8x22xf32>
    %20 = arith.addf %15, %19 : vector<8x22xf32>
    %c0_19 = arith.constant 0 : index
    %c5 = arith.constant 5 : index
    %21 = vector.load %arg1[%c0_19, %c5] : memref<8x32xf32, #tpu.memory_space<vmem>>, vector<8x22xf32>
    %c4_20 = arith.constant 4 : index
    %c0_21 = arith.constant 0 : index
    %c0_22 = arith.constant 0 : index
    %22 = vector.load %arg2[%c4_20, %c0_21, %c0_22] : memref<9x8x8xf32, #tpu.memory_space<vmem>>, vector<1x8x8xf32>
    %23 = vector.shape_cast %22 : vector<1x8x8xf32> to vector<8x8xf32>
    %cst_23 = arith.constant dense<0.000000e+00> : vector<8x22xf32>
    %24 = tpu.matmul %23, %21, %cst_23 {dimension_numbers = #tpu.dot_dimension_numbers<[1], [0], [0], [1], [0, 0, 1, 1], [], []>} : vector<8x8xf32>, vector<8x22xf32>, vector<8x22xf32> -> vector<8x22xf32>
    %25 = arith.addf %20, %24 : vector<8x22xf32>
    %c0_24 = arith.constant 0 : index
    %c6 = arith.constant 6 : index
    %26 = vector.load %arg1[%c0_24, %c6] : memref<8x32xf32, #tpu.memory_space<vmem>>, vector<8x22xf32>
    %c5_25 = arith.constant 5 : index
    %c0_26 = arith.constant 0 : index
    %c0_27 = arith.constant 0 : index
    %27 = vector.load %arg2[%c5_25, %c0_26, %c0_27] : memref<9x8x8xf32, #tpu.memory_space<vmem>>, vector<1x8x8xf32>
    %28 = vector.shape_cast %27 : vector<1x8x8xf32> to vector<8x8xf32>
    %cst_28 = arith.constant dense<0.000000e+00> : vector<8x22xf32>
    %29 = tpu.matmul %28, %26, %cst_28 {dimension_numbers = #tpu.dot_dimension_numbers<[1], [0], [0], [1], [0, 0, 1, 1], [], []>} : vector<8x8xf32>, vector<8x22xf32>, vector<8x22xf32> -> vector<8x22xf32>
    %30 = arith.addf %25, %29 : vector<8x22xf32>
    %c0_29 = arith.constant 0 : index
    %c8 = arith.constant 8 : index
    %31 = vector.load %arg1[%c0_29, %c8] : memref<8x32xf32, #tpu.memory_space<vmem>>, vector<8x22xf32>
    %c6_30 = arith.constant 6 : index
    %c0_31 = arith.constant 0 : index
    %c0_32 = arith.constant 0 : index
    %32 = vector.load %arg2[%c6_30, %c0_31, %c0_32] : memref<9x8x8xf32, #tpu.memory_space<vmem>>, vector<1x8x8xf32>
    %33 = vector.shape_cast %32 : vector<1x8x8xf32> to vector<8x8xf32>
    %cst_33 = arith.constant dense<0.000000e+00> : vector<8x22xf32>
    %34 = tpu.matmul %33, %31, %cst_33 {dimension_numbers = #tpu.dot_dimension_numbers<[1], [0], [0], [1], [0, 0, 1, 1], [], []>} : vector<8x8xf32>, vector<8x22xf32>, vector<8x22xf32> -> vector<8x22xf32>
    %35 = arith.addf %30, %34 : vector<8x22xf32>
    %c0_34 = arith.constant 0 : index
    %c9 = arith.constant 9 : index
    %36 = vector.load %arg1[%c0_34, %c9] : memref<8x32xf32, #tpu.memory_space<vmem>>, vector<8x22xf32>
    %c7 = arith.constant 7 : index
    %c0_35 = arith.constant 0 : index
    %c0_36 = arith.constant 0 : index
    %37 = vector.load %arg2[%c7, %c0_35, %c0_36] : memref<9x8x8xf32, #tpu.memory_space<vmem>>, vector<1x8x8xf32>
    %38 = vector.shape_cast %37 : vector<1x8x8xf32> to vector<8x8xf32>
    %cst_37 = arith.constant dense<0.000000e+00> : vector<8x22xf32>
    %39 = tpu.matmul %38, %36, %cst_37 {dimension_numbers = #tpu.dot_dimension_numbers<[1], [0], [0], [1], [0, 0, 1, 1], [], []>} : vector<8x8xf32>, vector<8x22xf32>, vector<8x22xf32> -> vector<8x22xf32>
    %40 = arith.addf %35, %39 : vector<8x22xf32>
    %c0_38 = arith.constant 0 : index
    %c10 = arith.constant 10 : index
    %41 = vector.load %arg1[%c0_38, %c10] : memref<8x32xf32, #tpu.memory_space<vmem>>, vector<8x22xf32>
    %c8_39 = arith.constant 8 : index
    %c0_40 = arith.constant 0 : index
    %c0_41 = arith.constant 0 : index
    %42 = vector.load %arg2[%c8_39, %c0_40, %c0_41] : memref<9x8x8xf32, #tpu.memory_space<vmem>>, vector<1x8x8xf32>
    %43 = vector.shape_cast %42 : vector<1x8x8xf32> to vector<8x8xf32>
    %cst_42 = arith.constant dense<0.000000e+00> : vector<8x22xf32>
    %44 = tpu.matmul %43, %41, %cst_42 {dimension_numbers = #tpu.dot_dimension_numbers<[1], [0], [0], [1], [0, 0, 1, 1], [], []>} : vector<8x8xf32>, vector<8x22xf32>, vector<8x22xf32> -> vector<8x22xf32>
    %45 = arith.addf %40, %44 : vector<8x22xf32>
    %c0_43 = arith.constant 0 : index
    %c0_44 = arith.constant 0 : index
    %46 = vector.load %arg3[%c0_43, %c0_44] : memref<8x1xf32, #tpu.memory_space<vmem>>, vector<8x1xf32>
    %47 = vector.broadcast %46 : vector<8x1xf32> to vector<8x22xf32>
    %48 = arith.addf %45, %47 : vector<8x22xf32>
    %c0_45 = arith.constant 0 : index
    %c0_46 = arith.constant 0 : index
    %49 = vector.load %arg6[%c0_45, %c0_46] : memref<1x22xf32, #tpu.memory_space<vmem>>, vector<1x22xf32>
    %50 = vector.broadcast %49 : vector<1x22xf32> to vector<8x22xf32>
    %51 = arith.mulf %48, %50 : vector<8x22xf32>
    %cst_47 = arith.constant dense<0.000000e+00> : vector<8xf32>
    %52 = vector.multi_reduction <add>, %51, %cst_47 [1] : vector<8x22xf32> to vector<8xf32>
    %53 = vector.shape_cast %52 : vector<8xf32> to vector<8x1xf32>
    %cst_48 = arith.constant 1.250000e-01 : f32
    %54 = vector.broadcast %cst_48 : f32 to vector<8x1xf32>
    %55 = arith.mulf %53, %54 : vector<8x1xf32>
    %56 = vector.broadcast %55 : vector<8x1xf32> to vector<8x22xf32>
    %57 = arith.subf %48, %56 : vector<8x22xf32>
    %58 = vector.broadcast %49 : vector<1x22xf32> to vector<8x22xf32>
    %59 = arith.mulf %57, %58 : vector<8x22xf32>
    %60 = arith.mulf %59, %59 : vector<8x22xf32>
    %cst_49 = arith.constant dense<0.000000e+00> : vector<8xf32>
    %61 = vector.multi_reduction <add>, %60, %cst_49 [1] : vector<8x22xf32> to vector<8xf32>
    %62 = vector.shape_cast %61 : vector<8xf32> to vector<8x1xf32>
    %cst_50 = arith.constant 1.250000e-01 : f32
    %63 = vector.broadcast %cst_50 : f32 to vector<8x1xf32>
    %64 = arith.mulf %62, %63 : vector<8x1xf32>
    %c0_51 = arith.constant 0 : index
    %c0_52 = arith.constant 0 : index
    %65 = vector.load %arg4[%c0_51, %c0_52] : memref<8x1xf32, #tpu.memory_space<vmem>>, vector<8x1xf32>
    %cst_53 = arith.constant 9.99999974E-6 : f32
    %66 = vector.broadcast %cst_53 : f32 to vector<8x1xf32>
    %67 = arith.addf %64, %66 : vector<8x1xf32>
    %68 = math.rsqrt %67 : vector<8x1xf32>
    %69 = arith.mulf %65, %68 : vector<8x1xf32>
    %c0_54 = arith.constant 0 : index
    %c0_55 = arith.constant 0 : index
    %70 = vector.load %arg5[%c0_54, %c0_55] : memref<8x1xf32, #tpu.memory_space<vmem>>, vector<8x1xf32>
    %71 = arith.mulf %55, %69 : vector<8x1xf32>
    %72 = arith.subf %70, %71 : vector<8x1xf32>
    %73 = vector.broadcast %69 : vector<8x1xf32> to vector<8x22xf32>
    %74 = arith.mulf %48, %73 : vector<8x22xf32>
    %75 = vector.broadcast %72 : vector<8x1xf32> to vector<8x22xf32>
    %76 = arith.addf %74, %75 : vector<8x22xf32>
    %cst_56 = arith.constant 0.000000e+00 : f32
    %77 = vector.broadcast %cst_56 : f32 to vector<8x22xf32>
    %78 = arith.maximumf %76, %77 : vector<8x22xf32>
    %c0_57 = arith.constant 0 : index
    %c0_58 = arith.constant 0 : index
    %79 = vector.load %arg7[%c0_57, %c0_58] : memref<8x22xf32, #tpu.memory_space<vmem>>, vector<8x22xf32>
    tpu.vector_store %arg7[%c0_57, %c0_58], %78 {strides = array<i32>} : memref<8x22xf32, #tpu.memory_space<vmem>>, vector<8x22xf32>,
    return
  }
  func.func @transform_0(%arg0: i32) -> (i32, i32) {
    %c0_i32 = arith.constant 0 : i32
    %c0_i32_0 = arith.constant 0 : i32
    %c0_i32_1 = arith.constant 0 : i32
    return %c0_i32, %c0_i32_0 : i32, i32
  }
  func.func @transform_1(%arg0: i32) -> (i32, i32, i32) {
    %c0_i32 = arith.constant 0 : i32
    %c0_i32_0 = arith.constant 0 : i32
    %c0_i32_1 = arith.constant 0 : i32
    %c0_i32_2 = arith.constant 0 : i32
    return %c0_i32, %c0_i32_0, %c0_i32_1 : i32, i32, i32
  }
  func.func @transform_2(%arg0: i32) -> (i32, i32) {
    %c0_i32 = arith.constant 0 : i32
    %c0_i32_0 = arith.constant 0 : i32
    %c0_i32_1 = arith.constant 0 : i32
    return %c0_i32, %c0_i32_0 : i32, i32
  }
  func.func @transform_3(%arg0: i32) -> (i32, i32) {
    %c0_i32 = arith.constant 0 : i32
    %c0_i32_0 = arith.constant 0 : i32
    %c0_i32_1 = arith.constant 0 : i32
    return %c0_i32, %c0_i32_0 : i32, i32
  }
  func.func @transform_4(%arg0: i32) -> (i32, i32) {
    %c0_i32 = arith.constant 0 : i32
    %c0_i32_0 = arith.constant 0 : i32
    %c0_i32_1 = arith.constant 0 : i32
    return %c0_i32, %c0_i32_0 : i32, i32
  }
  func.func @transform_5(%arg0: i32) -> (i32, i32) {
    %c0_i32 = arith.constant 0 : i32
    %c0_i32_0 = arith.constant 0 : i32
    %c0_i32_1 = arith.constant 0 : i32
    return %c0_i32, %c0_i32_0 : i32, i32
  }
  func.func @transform_6(%arg0: i32) -> (i32, i32) {
    %c0_i32 = arith.constant 0 : i32
    %c0_i32_0 = arith.constant 0 : i32
    %c0_i32_1 = arith.constant 0 : i32
    return %c0_i32, %c0_i32_0 : i32, i32
  }
}

module attributes {stable_mosaic.version = 11 : i64} {
  func.func @_upsample_add_kernel(%arg0: i32, %arg1: memref<16x1xf32, #tpu.memory_space<vmem>>, %arg2: memref<16x4xf32, #tpu.memory_space<vmem>>, %arg3: memref<1x4xi32, #tpu.memory_space<vmem>>, %arg4: memref<16x4xf32, #tpu.memory_space<vmem>>) attributes {dimension_semantics = [#tpu.dimension_semantics<arbitrary>], iteration_bounds = array<i64: 1>, scalar_prefetch = 0 : i64, scratch_operands = 0 : i64, tpu.core_type = #tpu.core_type<tc>, window_params = [{pipeline_mode = #tpu.pipeline_mode<synchronous>, transform_indices = @transform_0, window_bounds = array<i64: 16, 1>}, {pipeline_mode = #tpu.pipeline_mode<synchronous>, transform_indices = @transform_1, window_bounds = array<i64: 16, 4>}, {pipeline_mode = #tpu.pipeline_mode<synchronous>, transform_indices = @transform_2, window_bounds = array<i64: 1, 4>}, {pipeline_mode = #tpu.pipeline_mode<synchronous>, transform_indices = @transform_3, window_bounds = array<i64: 16, 4>}]} {
    %c0 = arith.constant 0 : index
    %c0_0 = arith.constant 0 : index
    %0 = vector.load %arg2[%c0, %c0_0] : memref<16x4xf32, #tpu.memory_space<vmem>>, vector<16x4xf32>
    %c0_1 = arith.constant 0 : index
    %c0_2 = arith.constant 0 : index
    %1 = vector.load %arg1[%c0_1, %c0_2] : memref<16x1xf32, #tpu.memory_space<vmem>>, vector<16x1xf32>
    %2 = vector.broadcast %1 : vector<16x1xf32> to vector<16x4xf32>
    %3 = arith.addf %0, %2 : vector<16x4xf32>
    %c0_3 = arith.constant 0 : index
    %c0_4 = arith.constant 0 : index
    %4 = vector.load %arg4[%c0_3, %c0_4] : memref<16x4xf32, #tpu.memory_space<vmem>>, vector<16x4xf32>
    tpu.vector_store %arg4[%c0_3, %c0_4], %3 {strides = array<i32>} : memref<16x4xf32, #tpu.memory_space<vmem>>, vector<16x4xf32>,
    return
  }
  func.func @transform_0(%arg0: i32) -> (i32, i32) {
    %c0_i32 = arith.constant 0 : i32
    %c0_i32_0 = arith.constant 0 : i32
    %c0_i32_1 = arith.constant 0 : i32
    return %c0_i32, %c0_i32_0 : i32, i32
  }
  func.func @transform_1(%arg0: i32) -> (i32, i32) {
    %c0_i32 = arith.constant 0 : i32
    %c0_i32_0 = arith.constant 0 : i32
    %c0_i32_1 = arith.constant 0 : i32
    return %c0_i32, %c0_i32_0 : i32, i32
  }
  func.func @transform_2(%arg0: i32) -> (i32, i32) {
    %c0_i32 = arith.constant 0 : i32
    %c0_i32_0 = arith.constant 0 : i32
    %c0_i32_1 = arith.constant 0 : i32
    return %c0_i32, %c0_i32_0 : i32, i32
  }
  func.func @transform_3(%arg0: i32) -> (i32, i32) {
    %c0_i32 = arith.constant 0 : i32
    %c0_i32_0 = arith.constant 0 : i32
    %c0_i32_1 = arith.constant 0 : i32
    return %c0_i32, %c0_i32_0 : i32, i32
  }
}

module attributes {stable_mosaic.version = 11 : i64} {
  func.func @_upsample_add_kernel(%arg0: i32, %arg1: memref<16x4xf32, #tpu.memory_space<vmem>>, %arg2: memref<16x16xf32, #tpu.memory_space<vmem>>, %arg3: memref<1x16xi32, #tpu.memory_space<vmem>>, %arg4: memref<16x16xf32, #tpu.memory_space<vmem>>) attributes {dimension_semantics = [#tpu.dimension_semantics<arbitrary>], iteration_bounds = array<i64: 1>, scalar_prefetch = 0 : i64, scratch_operands = 0 : i64, tpu.core_type = #tpu.core_type<tc>, window_params = [{pipeline_mode = #tpu.pipeline_mode<synchronous>, transform_indices = @transform_0, window_bounds = array<i64: 16, 4>}, {pipeline_mode = #tpu.pipeline_mode<synchronous>, transform_indices = @transform_1, window_bounds = array<i64: 16, 16>}, {pipeline_mode = #tpu.pipeline_mode<synchronous>, transform_indices = @transform_2, window_bounds = array<i64: 1, 16>}, {pipeline_mode = #tpu.pipeline_mode<synchronous>, transform_indices = @transform_3, window_bounds = array<i64: 16, 16>}]} {
    %0 = tpu.iota {dimensions = array<i32: 0>} : vector<4x16xi32>
    %c0 = arith.constant 0 : index
    %c0_0 = arith.constant 0 : index
    %1 = vector.load %arg3[%c0, %c0_0] : memref<1x16xi32, #tpu.memory_space<vmem>>, vector<1x16xi32>
    %2 = vector.broadcast %1 : vector<1x16xi32> to vector<4x16xi32>
    %3 = arith.cmpi eq, %0, %2 : vector<4x16xi32>
    %4 = arith.extui %3 : vector<4x16xi1> to vector<4x16xi32>
    %5 = arith.sitofp %4 : vector<4x16xi32> to vector<4x16xf32>
    %c0_1 = arith.constant 0 : index
    %c0_2 = arith.constant 0 : index
    %6 = vector.load %arg2[%c0_1, %c0_2] : memref<16x16xf32, #tpu.memory_space<vmem>>, vector<16x16xf32>
    %c0_3 = arith.constant 0 : index
    %c0_4 = arith.constant 0 : index
    %7 = vector.load %arg1[%c0_3, %c0_4] : memref<16x4xf32, #tpu.memory_space<vmem>>, vector<16x4xf32>
    %cst = arith.constant dense<0.000000e+00> : vector<16x16xf32>
    %8 = tpu.matmul %7, %5, %cst {dimension_numbers = #tpu.dot_dimension_numbers<[1], [0], [0], [1], [0, 0, 1, 1], [], []>} : vector<16x4xf32>, vector<4x16xf32>, vector<16x16xf32> -> vector<16x16xf32>
    %9 = arith.addf %6, %8 : vector<16x16xf32>
    %c0_5 = arith.constant 0 : index
    %c0_6 = arith.constant 0 : index
    %10 = vector.load %arg4[%c0_5, %c0_6] : memref<16x16xf32, #tpu.memory_space<vmem>>, vector<16x16xf32>
    tpu.vector_store %arg4[%c0_5, %c0_6], %9 {strides = array<i32>} : memref<16x16xf32, #tpu.memory_space<vmem>>, vector<16x16xf32>,
    return
  }
  func.func @transform_0(%arg0: i32) -> (i32, i32) {
    %c0_i32 = arith.constant 0 : i32
    %c0_i32_0 = arith.constant 0 : i32
    %c0_i32_1 = arith.constant 0 : i32
    return %c0_i32, %c0_i32_0 : i32, i32
  }
  func.func @transform_1(%arg0: i32) -> (i32, i32) {
    %c0_i32 = arith.constant 0 : i32
    %c0_i32_0 = arith.constant 0 : i32
    %c0_i32_1 = arith.constant 0 : i32
    return %c0_i32, %c0_i32_0 : i32, i32
  }
  func.func @transform_2(%arg0: i32) -> (i32, i32) {
    %c0_i32 = arith.constant 0 : i32
    %c0_i32_0 = arith.constant 0 : i32
    %c0_i32_1 = arith.constant 0 : i32
    return %c0_i32, %c0_i32_0 : i32, i32
  }
  func.func @transform_3(%arg0: i32) -> (i32, i32) {
    %c0_i32 = arith.constant 0 : i32
    %c0_i32_0 = arith.constant 0 : i32
    %c0_i32_1 = arith.constant 0 : i32
    return %c0_i32, %c0_i32_0 : i32, i32
  }
}

module attributes {stable_mosaic.version = 11 : i64} {
  func.func @_upsample_add_kernel(%arg0: i32, %arg1: memref<16x16xf32, #tpu.memory_space<vmem>>, %arg2: memref<16x64xf32, #tpu.memory_space<vmem>>, %arg3: memref<1x64xi32, #tpu.memory_space<vmem>>, %arg4: memref<16x64xf32, #tpu.memory_space<vmem>>) attributes {dimension_semantics = [#tpu.dimension_semantics<arbitrary>], iteration_bounds = array<i64: 1>, scalar_prefetch = 0 : i64, scratch_operands = 0 : i64, tpu.core_type = #tpu.core_type<tc>, window_params = [{pipeline_mode = #tpu.pipeline_mode<synchronous>, transform_indices = @transform_0, window_bounds = array<i64: 16, 16>}, {pipeline_mode = #tpu.pipeline_mode<synchronous>, transform_indices = @transform_1, window_bounds = array<i64: 16, 64>}, {pipeline_mode = #tpu.pipeline_mode<synchronous>, transform_indices = @transform_2, window_bounds = array<i64: 1, 64>}, {pipeline_mode = #tpu.pipeline_mode<synchronous>, transform_indices = @transform_3, window_bounds = array<i64: 16, 64>}]} {
    %0 = tpu.iota {dimensions = array<i32: 0>} : vector<16x64xi32>
    %c0 = arith.constant 0 : index
    %c0_0 = arith.constant 0 : index
    %1 = vector.load %arg3[%c0, %c0_0] : memref<1x64xi32, #tpu.memory_space<vmem>>, vector<1x64xi32>
    %2 = vector.broadcast %1 : vector<1x64xi32> to vector<16x64xi32>
    %3 = arith.cmpi eq, %0, %2 : vector<16x64xi32>
    %4 = arith.extui %3 : vector<16x64xi1> to vector<16x64xi32>
    %5 = arith.sitofp %4 : vector<16x64xi32> to vector<16x64xf32>
    %c0_1 = arith.constant 0 : index
    %c0_2 = arith.constant 0 : index
    %6 = vector.load %arg2[%c0_1, %c0_2] : memref<16x64xf32, #tpu.memory_space<vmem>>, vector<16x64xf32>
    %c0_3 = arith.constant 0 : index
    %c0_4 = arith.constant 0 : index
    %7 = vector.load %arg1[%c0_3, %c0_4] : memref<16x16xf32, #tpu.memory_space<vmem>>, vector<16x16xf32>
    %cst = arith.constant dense<0.000000e+00> : vector<16x64xf32>
    %8 = tpu.matmul %7, %5, %cst {dimension_numbers = #tpu.dot_dimension_numbers<[1], [0], [0], [1], [0, 0, 1, 1], [], []>} : vector<16x16xf32>, vector<16x64xf32>, vector<16x64xf32> -> vector<16x64xf32>
    %9 = arith.addf %6, %8 : vector<16x64xf32>
    %c0_5 = arith.constant 0 : index
    %c0_6 = arith.constant 0 : index
    %10 = vector.load %arg4[%c0_5, %c0_6] : memref<16x64xf32, #tpu.memory_space<vmem>>, vector<16x64xf32>
    tpu.vector_store %arg4[%c0_5, %c0_6], %9 {strides = array<i32>} : memref<16x64xf32, #tpu.memory_space<vmem>>, vector<16x64xf32>,
    return
  }
  func.func @transform_0(%arg0: i32) -> (i32, i32) {
    %c0_i32 = arith.constant 0 : i32
    %c0_i32_0 = arith.constant 0 : i32
    %c0_i32_1 = arith.constant 0 : i32
    return %c0_i32, %c0_i32_0 : i32, i32
  }
  func.func @transform_1(%arg0: i32) -> (i32, i32) {
    %c0_i32 = arith.constant 0 : i32
    %c0_i32_0 = arith.constant 0 : i32
    %c0_i32_1 = arith.constant 0 : i32
    return %c0_i32, %c0_i32_0 : i32, i32
  }
  func.func @transform_2(%arg0: i32) -> (i32, i32) {
    %c0_i32 = arith.constant 0 : i32
    %c0_i32_0 = arith.constant 0 : i32
    %c0_i32_1 = arith.constant 0 : i32
    return %c0_i32, %c0_i32_0 : i32, i32
  }
  func.func @transform_3(%arg0: i32) -> (i32, i32) {
    %c0_i32 = arith.constant 0 : i32
    %c0_i32_0 = arith.constant 0 : i32
    %c0_i32_1 = arith.constant 0 : i32
    return %c0_i32, %c0_i32_0 : i32, i32
  }
}

module attributes {stable_mosaic.version = 11 : i64} {
  func.func @_upsample_add_kernel(%arg0: i32, %arg1: memref<16x64xf32, #tpu.memory_space<vmem>>, %arg2: memref<16x256xf32, #tpu.memory_space<vmem>>, %arg3: memref<1x256xi32, #tpu.memory_space<vmem>>, %arg4: memref<16x256xf32, #tpu.memory_space<vmem>>) attributes {dimension_semantics = [#tpu.dimension_semantics<arbitrary>], iteration_bounds = array<i64: 1>, scalar_prefetch = 0 : i64, scratch_operands = 0 : i64, tpu.core_type = #tpu.core_type<tc>, window_params = [{pipeline_mode = #tpu.pipeline_mode<synchronous>, transform_indices = @transform_0, window_bounds = array<i64: 16, 64>}, {pipeline_mode = #tpu.pipeline_mode<synchronous>, transform_indices = @transform_1, window_bounds = array<i64: 16, 256>}, {pipeline_mode = #tpu.pipeline_mode<synchronous>, transform_indices = @transform_2, window_bounds = array<i64: 1, 256>}, {pipeline_mode = #tpu.pipeline_mode<synchronous>, transform_indices = @transform_3, window_bounds = array<i64: 16, 256>}]} {
    %0 = tpu.iota {dimensions = array<i32: 0>} : vector<64x256xi32>
    %c0 = arith.constant 0 : index
    %c0_0 = arith.constant 0 : index
    %1 = vector.load %arg3[%c0, %c0_0] : memref<1x256xi32, #tpu.memory_space<vmem>>, vector<1x256xi32>
    %2 = vector.broadcast %1 : vector<1x256xi32> to vector<64x256xi32>
    %3 = arith.cmpi eq, %0, %2 : vector<64x256xi32>
    %4 = arith.extui %3 : vector<64x256xi1> to vector<64x256xi32>
    %5 = arith.sitofp %4 : vector<64x256xi32> to vector<64x256xf32>
    %c0_1 = arith.constant 0 : index
    %c0_2 = arith.constant 0 : index
    %6 = vector.load %arg2[%c0_1, %c0_2] : memref<16x256xf32, #tpu.memory_space<vmem>>, vector<16x256xf32>
    %c0_3 = arith.constant 0 : index
    %c0_4 = arith.constant 0 : index
    %7 = vector.load %arg1[%c0_3, %c0_4] : memref<16x64xf32, #tpu.memory_space<vmem>>, vector<16x64xf32>
    %cst = arith.constant dense<0.000000e+00> : vector<16x256xf32>
    %8 = tpu.matmul %7, %5, %cst {dimension_numbers = #tpu.dot_dimension_numbers<[1], [0], [0], [1], [0, 0, 1, 1], [], []>} : vector<16x64xf32>, vector<64x256xf32>, vector<16x256xf32> -> vector<16x256xf32>
    %9 = arith.addf %6, %8 : vector<16x256xf32>
    %c0_5 = arith.constant 0 : index
    %c0_6 = arith.constant 0 : index
    %10 = vector.load %arg4[%c0_5, %c0_6] : memref<16x256xf32, #tpu.memory_space<vmem>>, vector<16x256xf32>
    tpu.vector_store %arg4[%c0_5, %c0_6], %9 {strides = array<i32>} : memref<16x256xf32, #tpu.memory_space<vmem>>, vector<16x256xf32>,
    return
  }
  func.func @transform_0(%arg0: i32) -> (i32, i32) {
    %c0_i32 = arith.constant 0 : i32
    %c0_i32_0 = arith.constant 0 : i32
    %c0_i32_1 = arith.constant 0 : i32
    return %c0_i32, %c0_i32_0 : i32, i32
  }
  func.func @transform_1(%arg0: i32) -> (i32, i32) {
    %c0_i32 = arith.constant 0 : i32
    %c0_i32_0 = arith.constant 0 : i32
    %c0_i32_1 = arith.constant 0 : i32
    return %c0_i32, %c0_i32_0 : i32, i32
  }
  func.func @transform_2(%arg0: i32) -> (i32, i32) {
    %c0_i32 = arith.constant 0 : i32
    %c0_i32_0 = arith.constant 0 : i32
    %c0_i32_1 = arith.constant 0 : i32
    return %c0_i32, %c0_i32_0 : i32, i32
  }
  func.func @transform_3(%arg0: i32) -> (i32, i32) {
    %c0_i32 = arith.constant 0 : i32
    %c0_i32_0 = arith.constant 0 : i32
    %c0_i32_1 = arith.constant 0 : i32
    return %c0_i32, %c0_i32_0 : i32, i32
  }
}

</mosaic_0001>

<bundles_post_ra>
// kernel: hourglass_forward.9
= control target key start
LH: loop header
LB: loop body
LE: loop exit
PB: predicated region body
PF: predicated region fallthrough
CT: control target
= control target key end

     0   :  { %v904_v1 = vmov 0.0   ;;  %s905_s23 = smov 127   ;;  %s906_s24 = smov 117   ;;  %v912_v3 = vmov 0   ;;  %vm34_vm0 = vcmask 1039360   ;;  %vm365_vm1 = vcmask 957440   ;;  %s1021_s0 = inlined_call_operand.vmem [shape: f32[8,200], index: 0, kind: input, shape index: {}]   ;;  %s1022_s2 = inlined_call_operand.vmem [shape: f32[8,1], index: 2, kind: input, shape index: {}]   ;;  %s1023_s1 = inlined_call_operand.vmem [shape: f32[9,8,8], index: 1, kind: input, shape index: {}]   ;;  %s1024_s5 = inlined_call_operand.vmem [shape: f32[1,178], index: 5, kind: input, shape index: {}]   ;;  %s1025_s3 = inlined_call_operand.vmem [shape: f32[8,1], index: 3, kind: input, shape index: {}]   ;;  %s1026_s4 = inlined_call_operand.vmem [shape: f32[8,1], index: 4, kind: input, shape index: {}]   ;;  %s1027_s6 = inlined_call_operand.vmem [shape: f32[8,178], index: 6, kind: output, shape index: {}]  }
   0x1   :  { %v23_v0 = vld [vmem:[%s1021_s0] sm:$0xff]  ;;  %106 = vmatprep.mubr.f32.mxu1 %v904_v1  ;;  %436 = vmatprep.mubr.f32.mxu0 %v904_v1  ;;  %v24_v2 = vld [vmem:[%s1021_s0 + $0x8] sm:$0xff]  ;;  %s907_s27 = smov 116   ;;  %s908_s28 = smov 108   ;;  %vm38_vm2 = vcmask 64512   ;;  %vm451_vm3 = vcmask 949248   ;;  %v799_v38 = vlaneseq }
   0x2   :  { %30 = vrot.lane.b32.xlu1 %v23_v0, %s905_s23  ;;  %361 = vrot.lane.b32.xlu0 %v23_v0, %s906_s24  ;;  %s909_s29 = smov 126   ;;  %s910_s30 = smov 107   ;;  %v789_v4 = vld [vmem:[%s1022_s2] sm:$0xff]  ;;  %v857_v9 = vld [vmem:[%s1023_s1 + $0x8] sm:$0xff]  ;;  %vm537_vm4 = vcmask 883712   ;;  %vm193_vm5 = vcmask 1031168  }
   0x3   :  { %s911_s7 = smov 118   ;;  %900 = vset.pattern.permute.xlu0 %v912_v3  ;;  %901 = vset.pattern.permute.xlu1 %v912_v3  ;;  %s913_s0 = smov 106   ;;  %v864_v10 = vld [vmem:[%s1023_s1 + $0x20] sm:$0xff]  ;;  %v866_v17 = vld [vmem:[%s1023_s1 + $0x28] sm:$0xff]  ;;  %vm623_vm6 = vcmask 875520   ;;  %v860_v24 = vld [vmem:[%s1023_s1 + $0x10] sm:$0xff] }
   0x4   :  { %v25_v16 = vld [vmem:[%s1023_s1] sm:$0xff]  ;;  %v868_v25 = vld [vmem:[%s1023_s1 + $0x30] sm:$0xff]  ;;  %vm279_vm7 = vcmask 965632   ;;  %vm709_vm8 = vcmask 867328   ;;  %v862_v32 = vld [vmem:[%s1023_s1 + $0x18] sm:$0xff]  ;;  %v800_v41 = vshrl.u32 %v799_v38, 7 }
   0x5   :  { %v870_v33 = vld [vmem:[%s1023_s1 + $0x38] sm:$0xff]  ;;  %v872_v37 = vld [vmem:[%s1023_s1 + $0x40] sm:$0xff]  ;;  %vm811_vm9 = vcmask 408576  }
   0x6   :  { %32 = vrot.lane.b32.xlu1 %v24_v2, %s905_s23  ;;  %363 = vrot.lane.b32.xlu0 %v24_v2, %s906_s24  ;;  %v805_v42 = vsub.s32 1, %v800_v41  ;;  %v797_v43 = vld [vmem:[%s1024_s5] sm:$0x3]  ;;  %v801_v44 = vsub.s32 0, %v800_v41 }
   0x8   :  { %v806_v50 = vrot.slane %v797_v43, %v805_v42  ;;  %v802_v52 = vrot.slane %v797_v43, %v801_v44 }
   0xa   :  { %449 = vrot.lane.b32.xlu1 %v24_v2, %s907_s27  ;;  %447 = vrot.lane.b32.xlu0 %v23_v0, %s907_s27 }
   0xe   :  { %535 = vrot.lane.b32.xlu1 %v24_v2, %s908_s28  ;;  %533 = vrot.lane.b32.xlu0 %v23_v0, %s908_s28 }
  0x12   :  { %191 = vrot.lane.b32.xlu1 %v24_v2, %s909_s29  ;;  %189 = vrot.lane.b32.xlu0 %v23_v0, %s909_s29 }
  0x16   :  { %621 = vrot.lane.b32.xlu1 %v24_v2, %s910_s30  ;;  %619 = vrot.lane.b32.xlu0 %v23_v0, %s910_s30 }
  0x1a   :  { %277 = vrot.lane.b32.xlu1 %v24_v2, %s911_s7  ;;  %275 = vrot.lane.b32.xlu0 %v23_v0, %s911_s7 }
  0x1e   :  { %707 = vrot.lane.b32.xlu1 %v24_v2, %s913_s0  ;;  %705 = vrot.lane.b32.xlu0 %v23_v0, %s913_s0 }
  0x22   :  { %792 = vperm.xlu0 %900, %v789_v4  }
  0x74   :  { %v31_v5 = vpop.permute.xlu1 %30  ;;  %v362_v6 = vpop.permute.xlu0 %361 }
  0x78   :  { %v33_v7 = vpop.permute.xlu1 %32  ;;  %v364_v8 = vpop.permute.xlu0 %363 }
  0x79   :  { %42 = vmatprep.subr.mxu1 %v33_v7  ;;  %372 = vmatprep.subr.mxu0 %v364_v8  ;;  %v35_v11 = vsel %vm34_vm0, %v31_v5, %v33_v7  ;;  %v366_v12 = vsel %vm365_vm1, %v362_v6, %v364_v8  ;;  %v828_v7 = vld [vmem:[%s1025_s3] sm:$0xff] }
  0x7a   :  { %43 = vmatpush1.msra.mxu1 %v35_v11  ;;  %373 = vmatpush1.msra.mxu0 %v366_v12 }
  0x7b   :  { %858 = vmatmul.mubr.msk.f32.vlgmr.msra.gmra.mrb[0].mxu1 %vm38_vm2, %v857_v9  ;;  %865 = vmatmul.mubr.msk.f32.vlgmr.msra.gmra.mrb[0].mxu0 %vm38_vm2, %v864_v10  ;;  %v832_v10 = vld [vmem:[%s1026_s4] sm:$0xff] }
  0x7c   :  { %v450_v13 = vpop.permute.xlu1 %449  ;;  %v448_v14 = vpop.permute.xlu0 %447  ;;  %116 = vmatprep.subr.mxu1 %v24_v2  ;;  %180 = vmatprep.mubr.f32.mxu1 %v904_v1 }
  0x7d   :  { %v452_v15 = vsel %vm451_vm3, %v448_v14, %v450_v13  ;;  %458 = vmatprep.subr.mxu0 %v450_v13  ;;  %117 = vmatpush1.msra.mxu1 %v23_v0 }
  0x7e   :  { %459 = vmatpush1.msra.mxu0 %v452_v15  ;;  %522 = vmatprep.mubr.f32.mxu0 %v904_v1 }
  0x80   :  { %v536_v18 = vpop.permute.xlu1 %535  ;;  %v534_v19 = vpop.permute.xlu0 %533 }
  0x81   :  { %v538_v20 = vsel %vm537_vm4, %v534_v19, %v536_v18  ;;  %544 = vmatprep.subr.mxu0 %v536_v18 }
  0x83   :  { %859 = vmatmul.mubr.msk.f32.vlgmr.msra.gmra.mrb[0].mxu1 %vm38_vm2, %v25_v16  ;;  %867 = vmatmul.mubr.msk.f32.vlgmr.msra.gmra.mrb[0].mxu0 %vm38_vm2, %v866_v17 }
  0x84   :  { %545 = vmatpush1.msra.mxu0 %v538_v20  ;;  %v192_v21 = vpop.permute.xlu1 %191  ;;  %v190_v22 = vpop.permute.xlu0 %189  ;;  %264 = vmatprep.mubr.f32.mxu1 %v904_v1 }
  0x85   :  { %v194_v23 = vsel %vm193_vm5, %v190_v22, %v192_v21  ;;  %200 = vmatprep.subr.mxu1 %v192_v21  ;;  %608 = vmatprep.mubr.f32.mxu0 %v904_v1 }
  0x86   :  { %201 = vmatpush1.msra.mxu1 %v194_v23 }
  0x88   :  { %v622_v26 = vpop.permute.xlu1 %621  ;;  %v620_v27 = vpop.permute.xlu0 %619 }
  0x89   :  { %v624_v28 = vsel %vm623_vm6, %v620_v27, %v622_v26  ;;  %630 = vmatprep.subr.mxu0 %v622_v26 }
  0x8b   :  { %861 = vmatmul.mubr.msk.f32.vlgmr.msra.gmra.mrb[0].mxu1 %vm38_vm2, %v860_v24  ;;  %869 = vmatmul.mubr.msk.f32.vlgmr.msra.gmra.mrb[0].mxu0 %vm38_vm2, %v868_v25 }
  0x8c   :  { %631 = vmatpush1.msra.mxu0 %v624_v28  ;;  %v278_v29 = vpop.permute.xlu1 %277  ;;  %v276_v30 = vpop.permute.xlu0 %275  ;;  %350 = vmatprep.mubr.f32.mxu1 %v904_v1 }
  0x8d   :  { %v280_v31 = vsel %vm279_vm7, %v276_v30, %v278_v29  ;;  %286 = vmatprep.subr.mxu1 %v278_v29  ;;  %694 = vmatprep.mubr.f32.mxu0 %v904_v1 }
  0x8e   :  { %287 = vmatpush1.msra.mxu1 %v280_v31 }
  0x90   :  { %v708_v34 = vpop.permute.xlu1 %707  ;;  %v706_v35 = vpop.permute.xlu0 %705 }
  0x91   :  { %v710_v36 = vsel %vm709_vm8, %v706_v35, %v708_v34  ;;  %716 = vmatprep.subr.mxu0 %v708_v34 }
  0x93   :  { %863 = vmatmul.mubr.msk.f32.vlgmr.msra.gmra.mrb[0].mxu1 %vm38_vm2, %v862_v32  ;;  %871 = vmatmul.mubr.msk.f32.vlgmr.msra.gmra.mrb[0].mxu0 %vm38_vm2, %v870_v33 }
  0x94   :  { %717 = vmatpush1.msra.mxu0 %v710_v36  ;;  %780 = vmatprep.mubr.f32.mxu0 %v904_v1 }
  0x9b   :  { %873 = vmatmul.mubr.msk.f32.vlgmr.msra.gmra.mrb[0].mxu0 %vm38_vm2, %v872_v37 }
  0xa1   :  { %v793_v46 = vpop.permute.xlu0 %792 }
 0x166   :  { %v352_v39 = vpop.f32.mrb[0].mxu1 }
 0x167   :  { %v354_v40 = vpop.f32.mrb[1].mxu1 }
 0x16e   :  { %v782_v45 = vpop.f32.mrb[0].mxu0 }
 0x16f   :  { %v874_v47 = vadd.f32 %v782_v45, %v352_v39  ;;  %v784_v48 = vpop.f32.mrb[1].mxu0 }
 0x170   :  { %v875_v49 = vadd.f32 %v784_v48, %v354_v40 }
 0x171   :  { %v795_v51 = vadd.f32 %v874_v47, %v793_v46 }
 0x172   :  { %v796_v53 = vadd.f32 %v875_v49, %v793_v46 }
 0x173   :  { %v809_v55 = vmul.f32 %v802_v52, %v795_v51 }
 0x174   :  { %v810_v54 = vmul.f32 %v806_v50, %v796_v53 }
 0x176   :  { %v812_v56 = vsel %vm811_vm9, %v810_v54, 0.0 }
 0x177   :  { %v813_v57 = vadd.f32 %v812_v56, %v809_v55 }
 0x179   :  { %814 = vadd.xlane.f32.xlu1 %v813_v57 }
 0x206   :  { %v815_v58 = vpop.xlane.xlu1 %814 }
 0x207   :  { %v816_v59 = vmul.f32 0.0078125, %v815_v58 }
 0x209   :  { %v817_v60 = vsub.f32 %v795_v51, %v816_v59  ;;  %v818_v61 = vsub.f32 %v796_v53, %v816_v59 }
 0x20b   :  { %v819_v62 = vmul.f32 %v817_v60, %v802_v52  ;;  %v820_v63 = vmul.f32 %v818_v61, %v806_v50 }
 0x20d   :  { %v821_v0 = vmul.f32 %v819_v62, %v819_v62  ;;  %v822_v1 = vmul.f32 %v820_v63, %v820_v63 }
 0x20f   :  { %v823_v2 = vsel %vm811_vm9, %v822_v1, 0.0 }
 0x210   :  { %v824_v3 = vadd.f32 %v823_v2, %v821_v0 }
 0x212   :  { %825 = vadd.xlane.f32.xlu0 %v824_v3 }
 0x29f   :  { %v826_v4 = vpop.xlane.xlu0 %825 }
 0x2a0   :  { %v827_v5 = vmul.f32 0.0078125, %v826_v4 }
 0x2a2   :  { %v829_v6 = vadd.f32 1e-05, %v827_v5 }
 0x2a4   :  { %902 = vrsqrt.f32 %v829_v6 }
 0x2ae   :  { %v903_v8 = vpop.eup %902 }
 0x2af   :  { %v831_v9 = vmul.f32 %v903_v8, %v828_v7 }
 0x2b1   :  { %837 = vperm.xlu1 %901, %v831_v9   ;;  %v833_v11 = vmul.f32 %v831_v9, %v816_v59 }
 0x2b3   :  { %v834_v12 = vsub.f32 %v832_v10, %v833_v11 }
 0x2b5   :  { %844 = vperm.xlu0 %900, %v834_v12  }
 0x330   :  { %v838_v13 = vpop.permute.xlu1 %837 }
 0x331   :  { %v840_v14 = vmul.f32 %v838_v13, %v795_v51  ;;  %v841_v15 = vmul.f32 %v838_v13, %v796_v53 }
 0x334   :  { %v845_v16 = vpop.permute.xlu0 %844 }
 0x335   :  { %v847_v17 = vadd.f32 %v845_v16, %v840_v14  ;;  %v848_v18 = vadd.f32 %v845_v16, %v841_v15 }
 0x337   :  { %v849_v19 = vmax.f32 %v847_v17, 0.0  ;;  %v850_v20 = vmax.f32 %v848_v18, 0.0 }
 0x339   :  { %851 = vst [vmem:[%s1027_s6] sm:$0xff] %v849_v19  ;;  %852 = vst.msk [vmem:[%s1027_s6 + $0x8] sm:$0xff] %vm811_vm9, %v850_v20 }

// kernel: hourglass_forward.8
= control target key start
LH: loop header
LB: loop body
LE: loop exit
PB: predicated region body
PF: predicated region fallthrough
CT: control target
= control target key end

     0   :  { %v2463_v2 = vmov 0.0   ;;  %s2464_s25 = smov 127   ;;  %s2465_s8 = smov 126   ;;  %v2472_v7 = vmov 0   ;;  %vm46_vm0 = vcmask 1039360   ;;  %vm56_vm1 = vcmask 64512   ;;  %s2756_s0 = inlined_call_operand.vmem [shape: f32[8,648], index: 0, kind: input, shape index: {}]   ;;  %s2757_s2 = inlined_call_operand.vmem [shape: f32[8,1], index: 2, kind: input, shape index: {}]   ;;  %s2758_s1 = inlined_call_operand.vmem [shape: f32[9,8,8], index: 1, kind: input, shape index: {}]   ;;  %s2759_s5 = inlined_call_operand.vmem [shape: f32[1,610], index: 5, kind: input, shape index: {}]   ;;  %s2760_s3 = inlined_call_operand.vmem [shape: f32[8,1], index: 3, kind: input, shape index: {}]   ;;  %s2761_s4 = inlined_call_operand.vmem [shape: f32[8,1], index: 4, kind: input, shape index: {}]   ;;  %s2762_s6 = inlined_call_operand.vmem [shape: f32[8,610], index: 6, kind: output, shape index: {}]  }
   0x1   :  { %v2512_v0 = vld [vmem:[%s2756_s0 + $0x8] sm:$0xff]  ;;  %v2517_v1 = vld [vmem:[%s2756_s0] sm:$0xff]  ;;  %124 = vmatprep.mubr.f32.mxu0 %v2463_v2  ;;  %195 = vmatprep.mubr.f32.mxu1 %v2463_v2  ;;  %v2526_v3 = vld [vmem:[%s2756_s0 + $0x10] sm:$0xff]  ;;  %s2466_s9 = smov 110   ;;  %s2467_s10 = smov 109   ;;  %vm2473_vm2 = vmmov 0  }
   0x2   :  { %38 = vrot.lane.b32.xlu0 %v2512_v0, %s2464_s25  ;;  %36 = vrot.lane.b32.xlu1 %v2517_v1, %s2464_s25  ;;  %v2531_v4 = vld [vmem:[%s2756_s0 + $0x18] sm:$0xff]  ;;  %v2538_v5 = vld [vmem:[%s2756_s0 + $0x20] sm:$0xff]  ;;  %s2468_s11 = smov 108   ;;  %s2469_s12 = smov 92   ;;  %vm499_vm3 = vcmask 1031168   ;;  %vm741_vm4 = vcmask 900096  }
   0x3   :  { %v1460_v6 = vld [vmem:[%s2756_s0 + $0x28] sm:$0xff]  ;;  %s2470_s15 = smov 91   ;;  %s2471_s16 = smov 90   ;;  %2459 = vset.pattern.permute.xlu1 %v2472_v7  ;;  %2460 = vset.pattern.permute.xlu0 %v2472_v7  ;;  %v2202_v8 = vld [vmem:[%s2757_s2] sm:$0xff]  ;;  %v2325_v30 = vld [vmem:[%s2758_s1 + $0x10] sm:$0xff]  ;;  %vm983_vm5 = vcmask 891904  }
   0x4   :  { %v2318_v14 = vld [vmem:[%s2758_s1 + $0x8] sm:$0xff]  ;;  %v28_v23 = vld [vmem:[%s2758_s1] sm:$0xff]  ;;  %v2329_v39 = vld [vmem:[%s2758_s1 + $0x18] sm:$0xff]  ;;  %vm1225_vm6 = vcmask 883712   ;;  %vm1481_vm7 = vcmask 752640   ;;  %vm1726_vm8 = vcmask 744448  }
   0x5   :  { %v2333_v48 = vld [vmem:[%s2758_s1 + $0x20] sm:$0xff]  ;;  %v2337_v56 = vld [vmem:[%s2758_s1 + $0x28] sm:$0xff]  ;;  %vm1971_vm9 = vcmask 736256   ;;  %vm2248_vm10 = vcmask 801792  }
   0x6   :  { %40 = vrot.lane.b32.xlu0 %v2526_v3, %s2464_s25  ;;  %42 = vrot.lane.b32.xlu1 %v2531_v4, %s2464_s25 }
   0xa   :  { %44 = vrot.lane.b32.xlu0 %v2538_v5, %s2464_s25  ;;  %491 = vrot.lane.b32.xlu1 %v2512_v0, %s2465_s8 }
   0xe   :  { %493 = vrot.lane.b32.xlu0 %v2526_v3, %s2465_s8  ;;  %489 = vrot.lane.b32.xlu1 %v2517_v1, %s2465_s8 }
  0x12   :  { %495 = vrot.lane.b32.xlu0 %v2531_v4, %s2465_s8  ;;  %497 = vrot.lane.b32.xlu1 %v2538_v5, %s2465_s8 }
  0x16   :  { %733 = vrot.lane.b32.xlu0 %v2512_v0, %s2466_s9  ;;  %735 = vrot.lane.b32.xlu1 %v2526_v3, %s2466_s9 }
  0x1a   :  { %731 = vrot.lane.b32.xlu0 %v2517_v1, %s2466_s9  ;;  %737 = vrot.lane.b32.xlu1 %v2531_v4, %s2466_s9 }
  0x1e   :  { %739 = vrot.lane.b32.xlu0 %v2538_v5, %s2466_s9  ;;  %975 = vrot.lane.b32.xlu1 %v2512_v0, %s2467_s10 }
  0x22   :  { %977 = vrot.lane.b32.xlu0 %v2526_v3, %s2467_s10  ;;  %973 = vrot.lane.b32.xlu1 %v2517_v1, %s2467_s10 }
  0x26   :  { %979 = vrot.lane.b32.xlu0 %v2531_v4, %s2467_s10  ;;  %981 = vrot.lane.b32.xlu1 %v2538_v5, %s2467_s10 }
  0x2a   :  { %1217 = vrot.lane.b32.xlu0 %v2512_v0, %s2468_s11  ;;  %1219 = vrot.lane.b32.xlu1 %v2526_v3, %s2468_s11 }
  0x2e   :  { %1215 = vrot.lane.b32.xlu0 %v2517_v1, %s2468_s11  ;;  %1221 = vrot.lane.b32.xlu1 %v2531_v4, %s2468_s11 }
  0x32   :  { %1223 = vrot.lane.b32.xlu0 %v2538_v5, %s2468_s11  ;;  %1471 = vrot.lane.b32.xlu1 %v2512_v0, %s2469_s12 }
  0x36   :  { %1473 = vrot.lane.b32.xlu0 %v2526_v3, %s2469_s12  ;;  %1469 = vrot.lane.b32.xlu1 %v2517_v1, %s2469_s12 }
  0x3a   :  { %1475 = vrot.lane.b32.xlu0 %v2531_v4, %s2469_s12  ;;  %1477 = vrot.lane.b32.xlu1 %v2538_v5, %s2469_s12 }
  0x3e   :  { %1479 = vrot.lane.b32.xlu0 %v1460_v6, %s2469_s12  ;;  %1716 = vrot.lane.b32.xlu1 %v2512_v0, %s2470_s15 }
  0x42   :  { %1718 = vrot.lane.b32.xlu0 %v2526_v3, %s2470_s15  ;;  %1714 = vrot.lane.b32.xlu1 %v2517_v1, %s2470_s15 }
  0x46   :  { %1720 = vrot.lane.b32.xlu0 %v2531_v4, %s2470_s15  ;;  %1722 = vrot.lane.b32.xlu1 %v2538_v5, %s2470_s15 }
  0x4a   :  { %1724 = vrot.lane.b32.xlu0 %v1460_v6, %s2470_s15  ;;  %1961 = vrot.lane.b32.xlu1 %v2512_v0, %s2471_s16 }
  0x4e   :  { %1963 = vrot.lane.b32.xlu0 %v2526_v3, %s2471_s16  ;;  %1959 = vrot.lane.b32.xlu1 %v2517_v1, %s2471_s16 }
  0x52   :  { %1965 = vrot.lane.b32.xlu0 %v2531_v4, %s2471_s16  ;;  %1967 = vrot.lane.b32.xlu1 %v2538_v5, %s2471_s16 }
  0x56   :  { %1969 = vrot.lane.b32.xlu0 %v1460_v6, %s2471_s16  ;;  %2205 = vperm.xlu1 %2459, %v2202_v8  }
  0x74   :  { %v39_v9 = vpop.permute.xlu0 %38  ;;  %v37_v10 = vpop.permute.xlu1 %36 }
  0x75   :  { %v47_v15 = vsel %vm46_vm0, %v37_v10, %v39_v9 }
  0x78   :  { %v41_v11 = vpop.permute.xlu0 %40  ;;  %v43_v12 = vpop.permute.xlu1 %42 }
  0x79   :  { %v48_v13 = vsel %vm46_vm0, %v39_v9, %v41_v11  ;;  %v49_v19 = vsel %vm46_vm0, %v41_v11, %v43_v12 }
  0x7a   :  { %60 = vmatprep.subr.mxu0 %v48_v13 }
  0x7b   :  { %61 = vmatpush1.msra.mxu0 %v47_v15 }
  0x7c   :  { %v45_v16 = vpop.permute.xlu0 %44  ;;  %2319 = vmatmul.mubr.msk.f32.vlgmr.msra.gmra.mrb[0].mxu0 %vm56_vm1, %v2318_v14  ;;  %2371 = vmatprep.subr.mxu0 %v2463_v2  ;;  %v492_v17 = vpop.permute.xlu1 %491 }
  0x7d   :  { %2372 = vmatpush3.msra.mxu0 %v45_v16  ;;  %v50_v18 = vsel %vm46_vm0, %v43_v12, %v45_v16  ;;  %2373 = vmatprep.mubr.msk.f32.mxu0 %vm2473_vm2, %v2463_v2 }
  0x7e   :  { %131 = vmatprep.subr.mxu1 %v50_v18  ;;  %275 = vmatprep.subr.mxu0 %v2512_v0 }
  0x7f   :  { %132 = vmatpush1.msra.mxu1 %v49_v19 }
  0x80   :  { %v494_v20 = vpop.permute.xlu0 %493  ;;  %2320 = vmatmul.mubr.msk.f32.vlgmr.msra.gmra.mrb[0].mxu1 %vm56_vm1, %v2318_v14  ;;  %2374 = vmatmul.mubr.msk.f32.vlgmr.msra.gmra.mrb[2].mxu0 %vm56_vm1, %v2318_v14  ;;  %v490_v21 = vpop.permute.xlu1 %489  ;;  %v2345_v14 = vld [vmem:[%s2758_s1 + $0x38] sm:$0xff] }
  0x81   :  { %276 = vmatpush1.msra.mxu0 %v2517_v1  ;;  %v501_v22 = vsel %vm499_vm3, %v492_v17, %v494_v20  ;;  %339 = vmatprep.mubr.f32.mxu0 %v2463_v2  ;;  %v500_v24 = vsel %vm499_vm3, %v490_v21, %v492_v17  ;;  %v2341_v1 = vld [vmem:[%s2758_s1 + $0x30] sm:$0xff] }
  0x82   :  { %512 = vmatprep.subr.mxu0 %v501_v22  ;;  %346 = vmatprep.subr.mxu1 %v2531_v4 }
  0x83   :  { %347 = vmatpush1.msra.mxu1 %v2526_v3  ;;  %410 = vmatprep.mubr.f32.mxu1 %v2463_v2 }
  0x84   :  { %v496_v25 = vpop.permute.xlu0 %495  ;;  %2322 = vmatmul.mubr.msk.f32.vlgmr.msra.gmra.mrb[0].mxu0 %vm56_vm1, %v28_v23  ;;  %v498_v26 = vpop.permute.xlu1 %497  ;;  %2376 = vmatprep.subr.mxu1 %v2463_v2 }
  0x85   :  { %513 = vmatpush1.msra.mxu0 %v500_v24  ;;  %576 = vmatprep.mubr.f32.mxu0 %v2463_v2  ;;  %v503_v29 = vsel %vm499_vm3, %v496_v25, %v498_v26  ;;  %v502_v31 = vsel %vm499_vm3, %v494_v20, %v496_v25 }
  0x86   :  { %2381 = vmatprep.subr.mxu0 %v2463_v2 }
  0x88   :  { %v734_v27 = vpop.permute.xlu0 %733  ;;  %2323 = vmatmul.mubr.msk.f32.vlgmr.msra.gmra.mrb[0].mxu1 %vm56_vm1, %v28_v23  ;;  %v736_v28 = vpop.permute.xlu1 %735 }
  0x89   :  { %2377 = vmatpush3.msra.mxu1 %v2538_v5  ;;  %2378 = vmatprep.mubr.msk.f32.mxu1 %vm2473_vm2, %v2463_v2  ;;  %v743_v34 = vsel %vm741_vm4, %v734_v27, %v736_v28 }
  0x8a   :  { %583 = vmatprep.subr.mxu1 %v503_v29 }
  0x8c   :  { %v732_v32 = vpop.permute.xlu0 %731  ;;  %2379 = vmatmul.mubr.msk.f32.vlgmr.msra.gmra.mrb[2].mxu1 %vm56_vm1, %v28_v23  ;;  %2326 = vmatmul.mubr.msk.f32.vlgmr.msra.gmra.mrb[0].mxu0 %vm56_vm1, %v2325_v30  ;;  %v738_v33 = vpop.permute.xlu1 %737 }
  0x8d   :  { %584 = vmatpush1.msra.mxu1 %v502_v31  ;;  %2382 = vmatpush3.msra.mxu0 %v498_v26  ;;  %v742_v35 = vsel %vm741_vm4, %v732_v32, %v734_v27  ;;  %v744_v40 = vsel %vm741_vm4, %v736_v28, %v738_v33  ;;  %v2349_v26 = vld [vmem:[%s2758_s1 + $0x40] sm:$0xff] }
  0x8e   :  { %754 = vmatprep.subr.mxu0 %v743_v34  ;;  %647 = vmatprep.mubr.f32.mxu1 %v2463_v2 }
  0x8f   :  { %2383 = vmatprep.mubr.msk.f32.mxu0 %vm2473_vm2, %v2463_v2 }
  0x90   :  { %v740_v36 = vpop.permute.xlu0 %739  ;;  %2327 = vmatmul.mubr.msk.f32.vlgmr.msra.gmra.mrb[0].mxu1 %vm56_vm1, %v2325_v30  ;;  %2384 = vmatmul.mubr.msk.f32.vlgmr.msra.gmra.mrb[4].mxu0 %vm56_vm1, %v2325_v30  ;;  %v976_v37 = vpop.permute.xlu1 %975 }
  0x91   :  { %755 = vmatpush1.msra.mxu0 %v742_v35  ;;  %v745_v38 = vsel %vm741_vm4, %v738_v33, %v740_v36  ;;  %818 = vmatprep.mubr.f32.mxu0 %v2463_v2 }
  0x92   :  { %825 = vmatprep.subr.mxu1 %v745_v38  ;;  %889 = vmatprep.mubr.f32.mxu1 %v2463_v2 }
  0x93   :  { %826 = vmatpush1.msra.mxu1 %v744_v40 }
  0x94   :  { %v978_v41 = vpop.permute.xlu0 %977  ;;  %2330 = vmatmul.mubr.msk.f32.vlgmr.msra.gmra.mrb[0].mxu0 %vm56_vm1, %v2329_v39  ;;  %v974_v42 = vpop.permute.xlu1 %973  ;;  %2386 = vmatprep.subr.mxu1 %v2463_v2 }
  0x95   :  { %v984_v43 = vsel %vm983_vm5, %v974_v42, %v976_v37  ;;  %v985_v44 = vsel %vm983_vm5, %v976_v37, %v978_v41  ;;  %1060 = vmatprep.mubr.f32.mxu0 %v2463_v2 }
  0x96   :  { %996 = vmatprep.subr.mxu0 %v985_v44 }
  0x97   :  { %997 = vmatpush1.msra.mxu0 %v984_v43 }
  0x98   :  { %v980_v45 = vpop.permute.xlu0 %979  ;;  %2331 = vmatmul.mubr.msk.f32.vlgmr.msra.gmra.mrb[0].mxu1 %vm56_vm1, %v2329_v39  ;;  %v982_v46 = vpop.permute.xlu1 %981  ;;  %2391 = vmatprep.subr.mxu0 %v2463_v2 }
  0x99   :  { %2387 = vmatpush3.msra.mxu1 %v740_v36  ;;  %v987_v47 = vsel %vm983_vm5, %v980_v45, %v982_v46  ;;  %2388 = vmatprep.mubr.msk.f32.mxu1 %vm2473_vm2, %v2463_v2  ;;  %v986_v49 = vsel %vm983_vm5, %v978_v41, %v980_v45 }
  0x9a   :  { %1067 = vmatprep.subr.mxu1 %v987_v47 }
  0x9c   :  { %v1218_v50 = vpop.permute.xlu0 %1217  ;;  %2389 = vmatmul.mubr.msk.f32.vlgmr.msra.gmra.mrb[4].mxu1 %vm56_vm1, %v2329_v39  ;;  %2334 = vmatmul.mubr.msk.f32.vlgmr.msra.gmra.mrb[0].mxu0 %vm56_vm1, %v2333_v48  ;;  %v1220_v51 = vpop.permute.xlu1 %1219 }
  0x9d   :  { %1068 = vmatpush1.msra.mxu1 %v986_v49  ;;  %2392 = vmatpush3.msra.mxu0 %v982_v46  ;;  %v1227_v52 = vsel %vm1225_vm6, %v1218_v50, %v1220_v51 }
  0x9e   :  { %1238 = vmatprep.subr.mxu0 %v1227_v52  ;;  %1131 = vmatprep.mubr.f32.mxu1 %v2463_v2  ;;  %v2215_v52 = vlaneseq }
  0x9f   :  { %2393 = vmatprep.mubr.msk.f32.mxu0 %vm2473_vm2, %v2463_v2 }
  0xa0   :  { %v1216_v53 = vpop.permute.xlu0 %1215  ;;  %2335 = vmatmul.mubr.msk.f32.vlgmr.msra.gmra.mrb[0].mxu1 %vm56_vm1, %v2333_v48  ;;  %2394 = vmatmul.mubr.msk.f32.vlgmr.msra.gmra.mrb[6].mxu0 %vm56_vm1, %v2333_v48  ;;  %v1222_v54 = vpop.permute.xlu1 %1221 }
  0xa1   :  { %v1226_v55 = vsel %vm1225_vm6, %v1216_v53, %v1218_v50  ;;  %1302 = vmatprep.mubr.f32.mxu0 %v2463_v2  ;;  %1373 = vmatprep.mubr.f32.mxu1 %v2463_v2  ;;  %v1228_v60 = vsel %vm1225_vm6, %v1220_v51, %v1222_v54  ;;  %v2216_v53 = vshrl.u32 %v2215_v52, 7  ;;  %v2277_v52 = vld [vmem:[%s2760_s3] sm:$0xff] }
  0xa2   :  { %1239 = vmatpush1.msra.mxu0 %v1226_v55 }
  0xa4   :  { %v1224_v57 = vpop.permute.xlu0 %1223  ;;  %v1472_v58 = vpop.permute.xlu1 %1471  ;;  %2338 = vmatmul.mubr.msk.f32.vlgmr.msra.gmra.mrb[0].mxu0 %vm56_vm1, %v2337_v56 }
  0xa5   :  { %v1229_v59 = vsel %vm1225_vm6, %v1222_v54, %v1224_v57  ;;  %1559 = vmatprep.mubr.f32.mxu0 %v2463_v2  ;;  %v2217_v54 = vsub.s32 0, %v2216_v53 }
  0xa6   :  { %1309 = vmatprep.subr.mxu1 %v1229_v59 }
  0xa7   :  { %1310 = vmatpush1.msra.mxu1 %v1228_v60 }
  0xa8   :  { %v1474_v61 = vpop.permute.xlu0 %1473  ;;  %2339 = vmatmul.mubr.msk.f32.vlgmr.msra.gmra.mrb[0].mxu1 %vm56_vm1, %v2337_v56  ;;  %2396 = vmatprep.subr.mxu1 %v2463_v2  ;;  %v1470_v62 = vpop.permute.xlu1 %1469 }
  0xa9   :  { %v1482_v63 = vsel %vm1481_vm7, %v1470_v62, %v1472_v58  ;;  %2397 = vmatpush3.msra.mxu1 %v1224_v57  ;;  %v1483_v0 = vsel %vm1481_vm7, %v1472_v58, %v1474_v61  ;;  %2398 = vmatprep.mubr.msk.f32.mxu1 %vm2473_vm2, %v2463_v2  ;;  %v2221_v57 = vsub.s32 1, %v2216_v53  ;;  %v2225_v62 = vsub.s32 2, %v2216_v53 }
  0xaa   :  { %1495 = vmatprep.subr.mxu0 %v1483_v0 }
  0xab   :  { %1496 = vmatpush1.msra.mxu0 %v1482_v63 }
  0xac   :  { %v1476_v3 = vpop.permute.xlu0 %1475  ;;  %2399 = vmatmul.mubr.msk.f32.vlgmr.msra.gmra.mrb[6].mxu1 %vm56_vm1, %v2337_v56  ;;  %v1478_v4 = vpop.permute.xlu1 %1477  ;;  %2342 = vmatmul.mubr.msk.f32.vlgmr.msra.gmra.mrb[0].mxu0 %vm56_vm1, %v2341_v1  ;;  %v2213_v56 = vld [vmem:[%s2759_s5] sm:$0x1f] }
  0xad   :  { %v1484_v5 = vsel %vm1481_vm7, %v1474_v61, %v1476_v3  ;;  %v1485_v6 = vsel %vm1481_vm7, %v1476_v3, %v1478_v4  ;;  %2401 = vmatprep.subr.mxu0 %v2463_v2  ;;  %2403 = vmatprep.mubr.msk.f32.mxu0 %vm2473_vm2, %v2463_v2  ;;  %v2218_v61 = vrot.slane %v2213_v56, %v2217_v54 }
  0xae   :  { %1566 = vmatprep.subr.mxu1 %v1485_v6  ;;  %1630 = vmatprep.mubr.f32.mxu1 %v2463_v2  ;;  %v2222_v0 = vrot.slane %v2213_v56, %v2221_v57 }
  0xaf   :  { %1567 = vmatpush1.msra.mxu1 %v1484_v5 }
  0xb0   :  { %v1480_v7 = vpop.permute.xlu0 %1479  ;;  %v1717_v8 = vpop.permute.xlu1 %1716  ;;  %2343 = vmatmul.mubr.msk.f32.vlgmr.msra.gmra.mrb[0].mxu1 %vm56_vm1, %v2341_v1 }
  0xb1   :  { %v1486_v9 = vsel %vm1481_vm7, %v1478_v4, %v1480_v7  ;;  %1875 = vmatprep.mubr.f32.mxu1 %v2463_v2  ;;  %v2229_v4 = vsub.s32 3, %v2216_v53  ;;  %v2226_v7 = vrot.slane %v2213_v56, %v2225_v62 }
  0xb2   :  { %2402 = vmatpush3.msra.mxu0 %v1486_v9 }
  0xb3   :  { %2404 = vmatmul.mubr.msk.f32.vlgmr.msra.gmra.mrb[8].mxu0 %vm56_vm1, %v2341_v1 }
  0xb4   :  { %v1719_v10 = vpop.permute.xlu0 %1718  ;;  %v1715_v11 = vpop.permute.xlu1 %1714  ;;  %1804 = vmatprep.mubr.f32.mxu0 %v2463_v2 }
  0xb5   :  { %v1727_v12 = vsel %vm1726_vm8, %v1715_v11, %v1717_v8  ;;  %v1728_v13 = vsel %vm1726_vm8, %v1717_v8, %v1719_v10 }
  0xb6   :  { %1740 = vmatprep.subr.mxu0 %v1728_v13  ;;  %v2230_v13 = vrot.slane %v2213_v56, %v2229_v4 }
  0xb7   :  { %1741 = vmatpush1.msra.mxu0 %v1727_v12 }
  0xb8   :  { %v1721_v15 = vpop.permute.xlu0 %1720  ;;  %v1723_v16 = vpop.permute.xlu1 %1722  ;;  %2346 = vmatmul.mubr.msk.f32.vlgmr.msra.gmra.mrb[0].mxu0 %vm56_vm1, %v2345_v14 }
  0xb9   :  { %v1729_v17 = vsel %vm1726_vm8, %v1719_v10, %v1721_v15  ;;  %v1730_v18 = vsel %vm1726_vm8, %v1721_v15, %v1723_v16  ;;  %2049 = vmatprep.mubr.f32.mxu0 %v2463_v2  ;;  %v2233_v10 = vsub.s32 4, %v2216_v53 }
  0xba   :  { %1811 = vmatprep.subr.mxu1 %v1730_v18 }
  0xbb   :  { %1812 = vmatpush1.msra.mxu1 %v1729_v17 }
  0xbc   :  { %v1725_v19 = vpop.permute.xlu0 %1724  ;;  %2347 = vmatmul.mubr.msk.f32.vlgmr.msra.gmra.mrb[0].mxu1 %vm56_vm1, %v2345_v14  ;;  %v1962_v20 = vpop.permute.xlu1 %1961  ;;  %2406 = vmatprep.subr.mxu1 %v2463_v2 }
  0xbd   :  { %v1731_v21 = vsel %vm1726_vm8, %v1723_v16, %v1725_v19  ;;  %2408 = vmatprep.mubr.msk.f32.mxu1 %vm2473_vm2, %v2463_v2 }
  0xbe   :  { %2407 = vmatpush3.msra.mxu1 %v1731_v21 }
  0xc0   :  { %v1964_v22 = vpop.permute.xlu0 %1963  ;;  %2409 = vmatmul.mubr.msk.f32.vlgmr.msra.gmra.mrb[8].mxu1 %vm56_vm1, %v2345_v14  ;;  %v1960_v23 = vpop.permute.xlu1 %1959 }
  0xc1   :  { %v1972_v24 = vsel %vm1971_vm9, %v1960_v23, %v1962_v20  ;;  %v1973_v25 = vsel %vm1971_vm9, %v1962_v20, %v1964_v22  ;;  %2120 = vmatprep.mubr.f32.mxu1 %v2463_v2  ;;  %v2234_v20 = vrot.slane %v2213_v56, %v2233_v10 }
  0xc2   :  { %1985 = vmatprep.subr.mxu0 %v1973_v25 }
  0xc3   :  { %1986 = vmatpush1.msra.mxu0 %v1972_v24 }
  0xc4   :  { %v1966_v27 = vpop.permute.xlu0 %1965  ;;  %2350 = vmatmul.mubr.msk.f32.vlgmr.msra.gmra.mrb[0].mxu0 %vm56_vm1, %v2349_v26  ;;  %v1968_v28 = vpop.permute.xlu1 %1967  ;;  %2411 = vmatprep.subr.mxu0 %v2463_v2 }
  0xc5   :  { %v1974_v29 = vsel %vm1971_vm9, %v1964_v22, %v1966_v27  ;;  %v1975_v30 = vsel %vm1971_vm9, %v1966_v27, %v1968_v28  ;;  %2413 = vmatprep.mubr.msk.f32.mxu0 %vm2473_vm2, %v2463_v2 }
  0xc6   :  { %2056 = vmatprep.subr.mxu1 %v1975_v30 }
  0xc7   :  { %2057 = vmatpush1.msra.mxu1 %v1974_v29 }
  0xc8   :  { %v1970_v31 = vpop.permute.xlu0 %1969  ;;  %2351 = vmatmul.mubr.msk.f32.vlgmr.msra.gmra.mrb[0].mxu1 %vm56_vm1, %v2349_v26 }
  0xc9   :  { %v1976_v32 = vsel %vm1971_vm9, %v1968_v28, %v1970_v31 }
  0xca   :  { %2412 = vmatpush3.msra.mxu0 %v1976_v32 }
  0xcb   :  { %2414 = vmatmul.mubr.msk.f32.vlgmr.msra.gmra.mrb[10].mxu0 %vm56_vm1, %v2349_v26 }
  0xd5   :  { %v2206_v60 = vpop.permute.xlu1 %2205 }
 0x153   :  { %v268_v33 = vpop.f32.mrb[2].mxu0 }
 0x154   :  { %v2375_v34 = vpop.f32.mrb[3].mxu0 }
 0x15f   :  { %v483_v35 = vpop.f32.mrb[2].mxu1 }
 0x160   :  { %v484_v36 = vadd.f32 %v483_v35, %v268_v33  ;;  %v2380_v37 = vpop.f32.mrb[3].mxu1 }
 0x163   :  { %v720_v38 = vpop.f32.mrb[4].mxu0 }
 0x164   :  { %v728_v39 = vadd.f32 %v720_v38, %v484_v36  ;;  %v2385_v40 = vpop.f32.mrb[5].mxu0 }
 0x16f   :  { %v962_v41 = vpop.f32.mrb[4].mxu1 }
 0x170   :  { %v970_v2 = vadd.f32 %v962_v41, %v728_v39  ;;  %v2390_v42 = vpop.f32.mrb[5].mxu1 }
 0x173   :  { %v1204_v43 = vpop.f32.mrb[6].mxu0 }
 0x174   :  { %v1212_v44 = vadd.f32 %v1204_v43, %v970_v2  ;;  %v2395_v45 = vpop.f32.mrb[7].mxu0 }
 0x17f   :  { %v1446_v46 = vpop.f32.mrb[6].mxu1 }
 0x180   :  { %v1454_v47 = vadd.f32 %v1446_v46, %v1212_v44  ;;  %v2400_v48 = vpop.f32.mrb[7].mxu1 }
 0x186   :  { %v1703_v49 = vpop.f32.mrb[8].mxu0 }
 0x187   :  { %v1711_v50 = vadd.f32 %v1703_v49, %v1454_v47  ;;  %v2405_v51 = vpop.f32.mrb[9].mxu0 }
 0x193   :  { %v1948_v55 = vpop.f32.mrb[8].mxu1 }
 0x194   :  { %v1956_v58 = vadd.f32 %v1948_v55, %v1711_v50  ;;  %v2410_v59 = vpop.f32.mrb[9].mxu1  ;;  %v2281_v55 = vld [vmem:[%s2761_s4] sm:$0xff] }
 0x197   :  { %v2051_v63 = vpop.f32.mrb[0].mxu0 }
 0x198   :  { %v2722_v1 = vadd.f32 %v2206_v60, %v2051_v63  ;;  %v2053_v3 = vpop.f32.mrb[1].mxu0 }
 0x199   :  { %v2724_v5 = vadd.f32 %v2206_v60, %v2053_v3 }
 0x19a   :  { %v2240_v6 = vmul.f32 %v2218_v61, %v2722_v1 }
 0x19b   :  { %v2241_v8 = vmul.f32 %v2222_v0, %v2724_v5  ;;  %v2122_v9 = vpop.f32.mrb[0].mxu1 }
 0x19c   :  { %v2210_v11 = vadd.f32 %v2206_v60, %v2122_v9  ;;  %v2124_v12 = vpop.f32.mrb[1].mxu1 }
 0x19d   :  { %v2245_v14 = vadd.f32 %v2241_v8, %v2240_v6  ;;  %v2211_v15 = vadd.f32 %v2206_v60, %v2124_v12 }
 0x19e   :  { %v2242_v16 = vmul.f32 %v2226_v7, %v2210_v11  ;;  %v2193_v17 = vpop.f32.mrb[10].mxu0 }
 0x19f   :  { %v2201_v18 = vadd.f32 %v2193_v17, %v1956_v58  ;;  %v2415_v19 = vpop.f32.mrb[11].mxu0  ;;  %v2243_v21 = vmul.f32 %v2230_v13, %v2211_v15 }
 0x1a0   :  { %v2246_v22 = vadd.f32 %v2245_v14, %v2242_v16 }
 0x1a1   :  { %v2212_v23 = vadd.f32 %v2206_v60, %v2201_v18 }
 0x1a2   :  { %v2247_v25 = vadd.f32 %v2246_v22, %v2243_v21 }
 0x1a3   :  { %v2244_v24 = vmul.f32 %v2234_v20, %v2212_v23 }
 0x1a5   :  { %v2249_v26 = vsel %vm2248_vm10, %v2244_v24, 0.0 }
 0x1a6   :  { %v2250_v27 = vadd.f32 %v2249_v26, %v2247_v25 }
 0x1a8   :  { %2251 = vadd.xlane.f32.xlu0 %v2250_v27 }
 0x235   :  { %v2252_v28 = vpop.xlane.xlu0 %2251 }
 0x236   :  { %v2253_v29 = vmul.f32 0.001953125, %v2252_v28 }
 0x238   :  { %v2254_v30 = vsub.f32 %v2722_v1, %v2253_v29  ;;  %v2255_v31 = vsub.f32 %v2724_v5, %v2253_v29  ;;  %v2256_v32 = vsub.f32 %v2210_v11, %v2253_v29  ;;  %v2257_v33 = vsub.f32 %v2211_v15, %v2253_v29 }
 0x239   :  { %v2258_v34 = vsub.f32 %v2212_v23, %v2253_v29 }
 0x23a   :  { %v2259_v35 = vmul.f32 %v2254_v30, %v2218_v61  ;;  %v2260_v36 = vmul.f32 %v2255_v31, %v2222_v0  ;;  %v2261_v37 = vmul.f32 %v2256_v32, %v2226_v7  ;;  %v2262_v39 = vmul.f32 %v2257_v33, %v2230_v13 }
 0x23b   :  { %v2263_v38 = vmul.f32 %v2258_v34, %v2234_v20 }
 0x23c   :  { %v2264_v40 = vmul.f32 %v2259_v35, %v2259_v35  ;;  %v2265_v41 = vmul.f32 %v2260_v36, %v2260_v36  ;;  %v2266_v2 = vmul.f32 %v2261_v37, %v2261_v37  ;;  %v2267_v44 = vmul.f32 %v2262_v39, %v2262_v39 }
 0x23d   :  { %v2268_v43 = vmul.f32 %v2263_v38, %v2263_v38 }
 0x23e   :  { %v2269_v42 = vadd.f32 %v2265_v41, %v2264_v40 }
 0x23f   :  { %v2272_v47 = vsel %vm2248_vm10, %v2268_v43, 0.0 }
 0x240   :  { %v2270_v45 = vadd.f32 %v2269_v42, %v2266_v2 }
 0x242   :  { %v2271_v46 = vadd.f32 %v2270_v45, %v2267_v44 }
 0x244   :  { %v2273_v48 = vadd.f32 %v2272_v47, %v2271_v46 }
 0x246   :  { %2274 = vadd.xlane.f32.xlu1 %v2273_v48 }
 0x2d3   :  { %v2275_v49 = vpop.xlane.xlu1 %2274 }
 0x2d4   :  { %v2276_v50 = vmul.f32 0.001953125, %v2275_v49 }
 0x2d6   :  { %v2278_v51 = vadd.f32 1e-05, %v2276_v50 }
 0x2d8   :  { %2461 = vrsqrt.f32 %v2278_v51 }
 0x2e2   :  { %v2462_v53 = vpop.eup %2461 }
 0x2e3   :  { %v2280_v54 = vmul.f32 %v2462_v53, %v2277_v52 }
 0x2e5   :  { %2286 = vperm.xlu0 %2460, %v2280_v54   ;;  %v2282_v56 = vmul.f32 %v2280_v54, %v2253_v29 }
 0x2e7   :  { %v2283_v57 = vsub.f32 %v2281_v55, %v2282_v56 }
 0x2e9   :  { %2296 = vperm.xlu1 %2459, %v2283_v57  }
 0x364   :  { %v2287_v58 = vpop.permute.xlu0 %2286 }
 0x365   :  { %v2289_v59 = vmul.f32 %v2287_v58, %v2722_v1  ;;  %v2290_v60 = vmul.f32 %v2287_v58, %v2724_v5  ;;  %v2291_v61 = vmul.f32 %v2287_v58, %v2210_v11  ;;  %v2292_v62 = vmul.f32 %v2287_v58, %v2211_v15 }
 0x366   :  { %v2293_v63 = vmul.f32 %v2287_v58, %v2212_v23 }
 0x368   :  { %v2297_v0 = vpop.permute.xlu1 %2296 }
 0x369   :  { %v2299_v3 = vadd.f32 %v2297_v0, %v2289_v59  ;;  %v2300_v4 = vadd.f32 %v2297_v0, %v2290_v60  ;;  %v2301_v6 = vadd.f32 %v2297_v0, %v2291_v61  ;;  %v2302_v7 = vadd.f32 %v2297_v0, %v2292_v62 }
 0x36a   :  { %v2303_v8 = vadd.f32 %v2297_v0, %v2293_v63 }
 0x36b   :  { %v2304_v9 = vmax.f32 %v2299_v3, 0.0  ;;  %v2305_v10 = vmax.f32 %v2300_v4, 0.0  ;;  %v2306_v12 = vmax.f32 %v2301_v6, 0.0  ;;  %v2307_v13 = vmax.f32 %v2302_v7, 0.0 }
 0x36c   :  { %v2308_v14 = vmax.f32 %v2303_v8, 0.0 }
 0x36d   :  { %2309 = vst [vmem:[%s2762_s6] sm:$0xff] %v2304_v9  ;;  %2310 = vst [vmem:[%s2762_s6 + $0x8] sm:$0xff] %v2305_v10 }
 0x36e   :  { %2311 = vst [vmem:[%s2762_s6 + $0x10] sm:$0xff] %v2306_v12  ;;  %2312 = vst [vmem:[%s2762_s6 + $0x18] sm:$0xff] %v2307_v13 }
 0x36f   :  { %2313 = vst.msk [vmem:[%s2762_s6 + $0x20] sm:$0xff] %vm2248_vm10, %v2308_v14 }

// kernel: hourglass_forward.10
= control target key start
LH: loop header
LB: loop body
LE: loop exit
PB: predicated region body
PF: predicated region fallthrough
CT: control target
= control target key end

     0   :  { %v879_v1 = vmov 0.0   ;;  %vm880_vm0 = vmmov 0   ;;  %s881_s23 = smov 127   ;;  %s882_s24 = smov 122   ;;  %vm31_vm1 = vcmask 64512   ;;  %v885_v3 = vmov 0   ;;  %s1009_s0 = inlined_call_operand.vmem [shape: f32[8,72], index: 0, kind: input, shape index: {}]   ;;  %s1010_s1 = inlined_call_operand.vmem [shape: f32[9,8,8], index: 1, kind: input, shape index: {}]   ;;  %s1011_s2 = inlined_call_operand.vmem [shape: f32[8,1], index: 2, kind: input, shape index: {}]   ;;  %s1012_s5 = inlined_call_operand.vmem [shape: f32[1,58], index: 5, kind: input, shape index: {}]   ;;  %s1013_s3 = inlined_call_operand.vmem [shape: f32[8,1], index: 3, kind: input, shape index: {}]   ;;  %s1014_s4 = inlined_call_operand.vmem [shape: f32[8,1], index: 4, kind: input, shape index: {}]   ;;  %s1015_s6 = inlined_call_operand.vmem [shape: f32[8,58], index: 6, kind: output, shape index: {}]  }
   0x1   :  { %v23_v0 = vld [vmem:[%s1009_s0] sm:$0xff]  ;;  %819 = vmatprep.subr.mxu0 %v879_v1  ;;  %821 = vmatprep.mubr.msk.f32.mxu0 %vm880_vm0, %v879_v1  ;;  %s883_s0 = smov 126   ;;  %s884_s27 = smov 121   ;;  %v783_v5 = vld [vmem:[%s1010_s1 + $0x8] sm:$0xff]  ;;  %v788_v8 = vld [vmem:[%s1010_s1 + $0x18] sm:$0xff]  ;;  %vm746_vm2 = vcmask 474112  }
   0x2   :  { %28 = vrot.lane.b32.xlu0 %v23_v0, %s881_s23  ;;  %259 = vrot.lane.b32.xlu1 %v23_v0, %s882_s24  ;;  %v24_v2 = vld [vmem:[%s1010_s1] sm:$0xff]  ;;  %s886_s28 = smov 120   ;;  %s887_s29 = smov 116   ;;  %v786_v9 = vld [vmem:[%s1010_s1 + $0x10] sm:$0xff] }
   0x3   :  { %824 = vmatprep.subr.mxu1 %v879_v1  ;;  %826 = vmatprep.mubr.msk.f32.mxu1 %vm880_vm0, %v879_v1  ;;  %s888_s30 = smov 115   ;;  %s889_s7 = smov 114   ;;  %v731_v4 = vld [vmem:[%s1011_s2] sm:$0xff]  ;;  %v792_v13 = vld [vmem:[%s1010_s1 + $0x28] sm:$0xff]  ;;  %v794_v16 = vld [vmem:[%s1010_s1 + $0x30] sm:$0xff] }
   0x4   :  { %825 = vmatpush3.msra.mxu1 %v23_v0  ;;  %875 = vset.pattern.permute.xlu0 %v885_v3  ;;  %v790_v12 = vld [vmem:[%s1010_s1 + $0x20] sm:$0xff]  ;;  %v796_v17 = vld [vmem:[%s1010_s1 + $0x38] sm:$0xff] }
   0x5   :  { %827 = vmatmul.mubr.msk.f32.vlgmr.msra.gmra.mrb[0].mxu1 %vm31_vm1, %v24_v2  ;;  %834 = vmatprep.subr.mxu1 %v879_v1  ;;  %v798_v20 = vld [vmem:[%s1010_s1 + $0x40] sm:$0xff] }
   0x6   :  { %180 = vrot.lane.b32.xlu0 %v23_v0, %s883_s0  ;;  %338 = vrot.lane.b32.xlu1 %v23_v0, %s884_s27  ;;  %v800_v48 = vld [vmem:[%s1012_s5] ss:$0 sm:$0xff] }
   0x7   :  { %836 = vmatprep.mubr.msk.f32.mxu1 %vm880_vm0, %v879_v1  ;;  %876 = vset.pattern.permute.xlu1 %v885_v3  ;;  %v758_v61 = vld [vmem:[%s1013_s3] sm:$0xff] }
   0xa   :  { %417 = vrot.lane.b32.xlu0 %v23_v0, %s886_s28  ;;  %496 = vrot.lane.b32.xlu1 %v23_v0, %s887_s29 }
   0xe   :  { %575 = vrot.lane.b32.xlu0 %v23_v0, %s888_s30  ;;  %654 = vrot.lane.b32.xlu1 %v23_v0, %s889_s7  ;;  %v762_v0 = vld [vmem:[%s1014_s4] sm:$0xff] }
  0x12   :  { %734 = vperm.xlu0 %875, %v731_v4  }
  0x74   :  { %v29_v6 = vpop.permute.xlu0 %28  ;;  %v260_v7 = vpop.permute.xlu1 %259 }
  0x75   :  { %820 = vmatpush3.msra.mxu0 %v29_v6  ;;  %835 = vmatpush3.msra.mxu1 %v260_v7 }
  0x76   :  { %822 = vmatmul.mubr.msk.f32.vlgmr.msra.gmra.mrb[0].mxu0 %vm31_vm1, %v783_v5  ;;  %829 = vmatprep.subr.mxu0 %v879_v1 }
  0x77   :  { %831 = vmatprep.mubr.msk.f32.mxu0 %vm880_vm0, %v879_v1  ;;  %837 = vmatmul.mubr.msk.f32.vlgmr.msra.gmra.mrb[2].mxu1 %vm31_vm1, %v788_v8 }
  0x78   :  { %v181_v10 = vpop.permute.xlu0 %180  ;;  %v339_v11 = vpop.permute.xlu1 %338  ;;  %844 = vmatprep.subr.mxu1 %v879_v1  ;;  %846 = vmatprep.mubr.msk.f32.mxu1 %vm880_vm0, %v879_v1 }
  0x79   :  { %830 = vmatpush3.msra.mxu0 %v181_v10 }
  0x7a   :  { %832 = vmatmul.mubr.msk.f32.vlgmr.msra.gmra.mrb[2].mxu0 %vm31_vm1, %v786_v9  ;;  %839 = vmatprep.subr.mxu0 %v879_v1 }
  0x7b   :  { %840 = vmatpush3.msra.mxu0 %v339_v11  ;;  %841 = vmatprep.mubr.msk.f32.mxu0 %vm880_vm0, %v879_v1 }
  0x7c   :  { %v418_v14 = vpop.permute.xlu0 %417  ;;  %v497_v15 = vpop.permute.xlu1 %496  ;;  %849 = vmatprep.subr.mxu0 %v879_v1 }
  0x7d   :  { %845 = vmatpush3.msra.mxu1 %v418_v14 }
  0x7e   :  { %842 = vmatmul.mubr.msk.f32.vlgmr.msra.gmra.mrb[4].mxu0 %vm31_vm1, %v790_v12  ;;  %847 = vmatmul.mubr.msk.f32.vlgmr.msra.gmra.mrb[4].mxu1 %vm31_vm1, %v792_v13 }
  0x7f   :  { %850 = vmatpush3.msra.mxu0 %v497_v15  ;;  %851 = vmatprep.mubr.msk.f32.mxu0 %vm880_vm0, %v879_v1 }
  0x80   :  { %v576_v18 = vpop.permute.xlu0 %575  ;;  %854 = vmatprep.subr.mxu1 %v879_v1  ;;  %856 = vmatprep.mubr.msk.f32.mxu1 %vm880_vm0, %v879_v1  ;;  %v655_v19 = vpop.permute.xlu1 %654 }
  0x81   :  { %855 = vmatpush3.msra.mxu1 %v576_v18  ;;  %859 = vmatprep.subr.mxu0 %v879_v1 }
  0x82   :  { %852 = vmatmul.mubr.msk.f32.vlgmr.msra.gmra.mrb[6].mxu0 %vm31_vm1, %v794_v16  ;;  %857 = vmatmul.mubr.msk.f32.vlgmr.msra.gmra.mrb[6].mxu1 %vm31_vm1, %v796_v17 }
  0x83   :  { %860 = vmatpush3.msra.mxu0 %v655_v19  ;;  %861 = vmatprep.mubr.msk.f32.mxu0 %vm880_vm0, %v879_v1 }
  0x86   :  { %862 = vmatmul.mubr.msk.f32.vlgmr.msra.gmra.mrb[8].mxu0 %vm31_vm1, %v798_v20 }
  0x91   :  { %v735_v45 = vpop.permute.xlu0 %734 }
  0xd8   :  { %v174_v21 = vpop.f32.mrb[0].mxu1 }
  0xd9   :  { %v828_v22 = vpop.f32.mrb[1].mxu1 }
 0x149   :  { %v101_v23 = vpop.f32.mrb[0].mxu0 }
 0x14a   :  { %v175_v24 = vadd.f32 %v174_v21, %v101_v23  ;;  %v823_v25 = vpop.f32.mrb[1].mxu0  ;;  %v331_v26 = vpop.f32.mrb[2].mxu1 }
 0x14b   :  { %v838_v27 = vpop.f32.mrb[3].mxu1 }
 0x14d   :  { %v252_v28 = vpop.f32.mrb[2].mxu0 }
 0x14e   :  { %v256_v29 = vadd.f32 %v252_v28, %v175_v24  ;;  %v833_v30 = vpop.f32.mrb[3].mxu0 }
 0x150   :  { %v335_v31 = vadd.f32 %v331_v26, %v256_v29 }
 0x151   :  { %v410_v32 = vpop.f32.mrb[4].mxu0  ;;  %v489_v33 = vpop.f32.mrb[4].mxu1 }
 0x152   :  { %v414_v34 = vadd.f32 %v410_v32, %v335_v31  ;;  %v843_v35 = vpop.f32.mrb[5].mxu0  ;;  %v848_v36 = vpop.f32.mrb[5].mxu1 }
 0x154   :  { %v493_v37 = vadd.f32 %v489_v33, %v414_v34 }
 0x155   :  { %v568_v38 = vpop.f32.mrb[6].mxu0  ;;  %v647_v39 = vpop.f32.mrb[6].mxu1 }
 0x156   :  { %v572_v40 = vadd.f32 %v568_v38, %v493_v37  ;;  %v853_v41 = vpop.f32.mrb[7].mxu0  ;;  %v858_v42 = vpop.f32.mrb[7].mxu1 }
 0x158   :  { %v651_v43 = vadd.f32 %v647_v39, %v572_v40 }
 0x159   :  { %v726_v44 = vpop.f32.mrb[8].mxu0 }
 0x15a   :  { %v730_v46 = vadd.f32 %v726_v44, %v651_v43  ;;  %v863_v47 = vpop.f32.mrb[9].mxu0 }
 0x15c   :  { %v737_v49 = vadd.f32 %v735_v45, %v730_v46 }
 0x15e   :  { %v745_v50 = vmul.f32 %v800_v48, %v737_v49 }
 0x160   :  { %v747_v51 = vsel %vm746_vm2, %v745_v50, 0.0 }
 0x161   :  { %748 = vadd.xlane.f32.xlu1 %v747_v51 }
 0x1ee   :  { %v749_v52 = vpop.xlane.xlu1 %748 }
 0x1ef   :  { %v750_v53 = vmul.f32 0.03125, %v749_v52 }
 0x1f1   :  { %v751_v54 = vsub.f32 %v737_v49, %v750_v53 }
 0x1f3   :  { %v752_v55 = vmul.f32 %v800_v48, %v751_v54 }
 0x1f5   :  { %v753_v56 = vmul.f32 %v752_v55, %v752_v55 }
 0x1f7   :  { %v754_v57 = vsel %vm746_vm2, %v753_v56, 0.0 }
 0x1f8   :  { %755 = vadd.xlane.f32.xlu0 %v754_v57 }
 0x285   :  { %v756_v58 = vpop.xlane.xlu0 %755 }
 0x286   :  { %v757_v59 = vmul.f32 0.03125, %v756_v58 }
 0x288   :  { %v759_v60 = vadd.f32 1e-05, %v757_v59 }
 0x28a   :  { %877 = vrsqrt.f32 %v759_v60 }
 0x294   :  { %v878_v62 = vpop.eup %877 }
 0x295   :  { %v761_v63 = vmul.f32 %v878_v62, %v758_v61 }
 0x297   :  { %767 = vperm.xlu1 %876, %v761_v63   ;;  %v763_v1 = vmul.f32 %v761_v63, %v750_v53 }
 0x299   :  { %v764_v2 = vsub.f32 %v762_v0, %v763_v1 }
 0x29b   :  { %773 = vperm.xlu0 %875, %v764_v2  }
 0x316   :  { %v768_v3 = vpop.permute.xlu1 %767 }
 0x317   :  { %v770_v4 = vmul.f32 %v768_v3, %v737_v49 }
 0x31a   :  { %v774_v5 = vpop.permute.xlu0 %773 }
 0x31b   :  { %v776_v6 = vadd.f32 %v774_v5, %v770_v4 }
 0x31d   :  { %v777_v7 = vmax.f32 %v776_v6, 0.0 }
 0x31f   :  { %778 = vst.msk [vmem:[%s1015_s6] sm:$0xff] %vm746_vm2, %v777_v7 }

// kernel: hourglass_forward.11
= control target key start
LH: loop header
LB: loop body
LE: loop exit
PB: predicated region body
PF: predicated region fallthrough
CT: control target
= control target key end

     0   :  { %v879_v1 = vmov 0.0   ;;  %vm880_vm0 = vmmov 0   ;;  %s881_s23 = smov 127   ;;  %s882_s24 = smov 124   ;;  %vm31_vm1 = vcmask 64512   ;;  %v885_v3 = vmov 0   ;;  %s1009_s0 = inlined_call_operand.vmem [shape: f32[8,32], index: 0, kind: input, shape index: {}]   ;;  %s1010_s1 = inlined_call_operand.vmem [shape: f32[9,8,8], index: 1, kind: input, shape index: {}]   ;;  %s1011_s2 = inlined_call_operand.vmem [shape: f32[8,1], index: 2, kind: input, shape index: {}]   ;;  %s1012_s5 = inlined_call_operand.vmem [shape: f32[1,22], index: 5, kind: input, shape index: {}]   ;;  %s1013_s3 = inlined_call_operand.vmem [shape: f32[8,1], index: 3, kind: input, shape index: {}]   ;;  %s1014_s4 = inlined_call_operand.vmem [shape: f32[8,1], index: 4, kind: input, shape index: {}]   ;;  %s1015_s6 = inlined_call_operand.vmem [shape: f32[8,22], index: 6, kind: output, shape index: {}]  }
   0x1   :  { %v23_v0 = vld [vmem:[%s1009_s0] sm:$0xff]  ;;  %819 = vmatprep.subr.mxu0 %v879_v1  ;;  %821 = vmatprep.mubr.msk.f32.mxu0 %vm880_vm0, %v879_v1  ;;  %s883_s0 = smov 126   ;;  %s884_s27 = smov 123   ;;  %v783_v5 = vld [vmem:[%s1010_s1 + $0x8] sm:$0xff]  ;;  %v788_v8 = vld [vmem:[%s1010_s1 + $0x18] sm:$0xff]  ;;  %vm746_vm2 = vcmask 179200  }
   0x2   :  { %28 = vrot.lane.b32.xlu0 %v23_v0, %s881_s23  ;;  %259 = vrot.lane.b32.xlu1 %v23_v0, %s882_s24  ;;  %v24_v2 = vld [vmem:[%s1010_s1] sm:$0xff]  ;;  %s886_s28 = smov 122   ;;  %s887_s29 = smov 120   ;;  %v786_v9 = vld [vmem:[%s1010_s1 + $0x10] sm:$0xff] }
   0x3   :  { %824 = vmatprep.subr.mxu1 %v879_v1  ;;  %826 = vmatprep.mubr.msk.f32.mxu1 %vm880_vm0, %v879_v1  ;;  %s888_s30 = smov 119   ;;  %s889_s7 = smov 118   ;;  %v731_v4 = vld [vmem:[%s1011_s2] sm:$0xff]  ;;  %v792_v13 = vld [vmem:[%s1010_s1 + $0x28] sm:$0xff]  ;;  %v794_v16 = vld [vmem:[%s1010_s1 + $0x30] sm:$0xff] }
   0x4   :  { %825 = vmatpush3.msra.mxu1 %v23_v0  ;;  %875 = vset.pattern.permute.xlu0 %v885_v3  ;;  %v790_v12 = vld [vmem:[%s1010_s1 + $0x20] sm:$0xff]  ;;  %v796_v17 = vld [vmem:[%s1010_s1 + $0x38] sm:$0xff] }
   0x5   :  { %827 = vmatmul.mubr.msk.f32.vlgmr.msra.gmra.mrb[0].mxu1 %vm31_vm1, %v24_v2  ;;  %834 = vmatprep.subr.mxu1 %v879_v1  ;;  %v798_v20 = vld [vmem:[%s1010_s1 + $0x40] sm:$0xff] }
   0x6   :  { %180 = vrot.lane.b32.xlu0 %v23_v0, %s883_s0  ;;  %338 = vrot.lane.b32.xlu1 %v23_v0, %s884_s27  ;;  %v800_v48 = vld [vmem:[%s1012_s5] ss:$0 sm:$0xff] }
   0x7   :  { %836 = vmatprep.mubr.msk.f32.mxu1 %vm880_vm0, %v879_v1  ;;  %876 = vset.pattern.permute.xlu1 %v885_v3  ;;  %v758_v61 = vld [vmem:[%s1013_s3] sm:$0xff] }
   0xa   :  { %417 = vrot.lane.b32.xlu0 %v23_v0, %s886_s28  ;;  %496 = vrot.lane.b32.xlu1 %v23_v0, %s887_s29 }
   0xe   :  { %575 = vrot.lane.b32.xlu0 %v23_v0, %s888_s30  ;;  %654 = vrot.lane.b32.xlu1 %v23_v0, %s889_s7  ;;  %v762_v0 = vld [vmem:[%s1014_s4] sm:$0xff] }
  0x12   :  { %734 = vperm.xlu0 %875, %v731_v4  }
  0x74   :  { %v29_v6 = vpop.permute.xlu0 %28  ;;  %v260_v7 = vpop.permute.xlu1 %259 }
  0x75   :  { %820 = vmatpush3.msra.mxu0 %v29_v6  ;;  %835 = vmatpush3.msra.mxu1 %v260_v7 }
  0x76   :  { %822 = vmatmul.mubr.msk.f32.vlgmr.msra.gmra.mrb[0].mxu0 %vm31_vm1, %v783_v5  ;;  %829 = vmatprep.subr.mxu0 %v879_v1 }
  0x77   :  { %831 = vmatprep.mubr.msk.f32.mxu0 %vm880_vm0, %v879_v1  ;;  %837 = vmatmul.mubr.msk.f32.vlgmr.msra.gmra.mrb[2].mxu1 %vm31_vm1, %v788_v8 }
  0x78   :  { %v181_v10 = vpop.permute.xlu0 %180  ;;  %v339_v11 = vpop.permute.xlu1 %338  ;;  %844 = vmatprep.subr.mxu1 %v879_v1  ;;  %846 = vmatprep.mubr.msk.f32.mxu1 %vm880_vm0, %v879_v1 }
  0x79   :  { %830 = vmatpush3.msra.mxu0 %v181_v10 }
  0x7a   :  { %832 = vmatmul.mubr.msk.f32.vlgmr.msra.gmra.mrb[2].mxu0 %vm31_vm1, %v786_v9  ;;  %839 = vmatprep.subr.mxu0 %v879_v1 }
  0x7b   :  { %840 = vmatpush3.msra.mxu0 %v339_v11  ;;  %841 = vmatprep.mubr.msk.f32.mxu0 %vm880_vm0, %v879_v1 }
  0x7c   :  { %v418_v14 = vpop.permute.xlu0 %417  ;;  %v497_v15 = vpop.permute.xlu1 %496  ;;  %849 = vmatprep.subr.mxu0 %v879_v1 }
  0x7d   :  { %845 = vmatpush3.msra.mxu1 %v418_v14 }
  0x7e   :  { %842 = vmatmul.mubr.msk.f32.vlgmr.msra.gmra.mrb[4].mxu0 %vm31_vm1, %v790_v12  ;;  %847 = vmatmul.mubr.msk.f32.vlgmr.msra.gmra.mrb[4].mxu1 %vm31_vm1, %v792_v13 }
  0x7f   :  { %850 = vmatpush3.msra.mxu0 %v497_v15  ;;  %851 = vmatprep.mubr.msk.f32.mxu0 %vm880_vm0, %v879_v1 }
  0x80   :  { %v576_v18 = vpop.permute.xlu0 %575  ;;  %854 = vmatprep.subr.mxu1 %v879_v1  ;;  %856 = vmatprep.mubr.msk.f32.mxu1 %vm880_vm0, %v879_v1  ;;  %v655_v19 = vpop.permute.xlu1 %654 }
  0x81   :  { %855 = vmatpush3.msra.mxu1 %v576_v18  ;;  %859 = vmatprep.subr.mxu0 %v879_v1 }
  0x82   :  { %852 = vmatmul.mubr.msk.f32.vlgmr.msra.gmra.mrb[6].mxu0 %vm31_vm1, %v794_v16  ;;  %857 = vmatmul.mubr.msk.f32.vlgmr.msra.gmra.mrb[6].mxu1 %vm31_vm1, %v796_v17 }
  0x83   :  { %860 = vmatpush3.msra.mxu0 %v655_v19  ;;  %861 = vmatprep.mubr.msk.f32.mxu0 %vm880_vm0, %v879_v1 }
  0x86   :  { %862 = vmatmul.mubr.msk.f32.vlgmr.msra.gmra.mrb[8].mxu0 %vm31_vm1, %v798_v20 }
  0x91   :  { %v735_v45 = vpop.permute.xlu0 %734 }
  0xd8   :  { %v174_v21 = vpop.f32.mrb[0].mxu1 }
  0xd9   :  { %v828_v22 = vpop.f32.mrb[1].mxu1 }
 0x149   :  { %v101_v23 = vpop.f32.mrb[0].mxu0 }
 0x14a   :  { %v175_v24 = vadd.f32 %v174_v21, %v101_v23  ;;  %v823_v25 = vpop.f32.mrb[1].mxu0  ;;  %v331_v26 = vpop.f32.mrb[2].mxu1 }
 0x14b   :  { %v838_v27 = vpop.f32.mrb[3].mxu1 }
 0x14d   :  { %v252_v28 = vpop.f32.mrb[2].mxu0 }
 0x14e   :  { %v256_v29 = vadd.f32 %v252_v28, %v175_v24  ;;  %v833_v30 = vpop.f32.mrb[3].mxu0 }
 0x150   :  { %v335_v31 = vadd.f32 %v331_v26, %v256_v29 }
 0x151   :  { %v410_v32 = vpop.f32.mrb[4].mxu0  ;;  %v489_v33 = vpop.f32.mrb[4].mxu1 }
 0x152   :  { %v414_v34 = vadd.f32 %v410_v32, %v335_v31  ;;  %v843_v35 = vpop.f32.mrb[5].mxu0  ;;  %v848_v36 = vpop.f32.mrb[5].mxu1 }
 0x154   :  { %v493_v37 = vadd.f32 %v489_v33, %v414_v34 }
 0x155   :  { %v568_v38 = vpop.f32.mrb[6].mxu0  ;;  %v647_v39 = vpop.f32.mrb[6].mxu1 }
 0x156   :  { %v572_v40 = vadd.f32 %v568_v38, %v493_v37  ;;  %v853_v41 = vpop.f32.mrb[7].mxu0  ;;  %v858_v42 = vpop.f32.mrb[7].mxu1 }
 0x158   :  { %v651_v43 = vadd.f32 %v647_v39, %v572_v40 }
 0x159   :  { %v726_v44 = vpop.f32.mrb[8].mxu0 }
 0x15a   :  { %v730_v46 = vadd.f32 %v726_v44, %v651_v43  ;;  %v863_v47 = vpop.f32.mrb[9].mxu0 }
 0x15c   :  { %v737_v49 = vadd.f32 %v735_v45, %v730_v46 }
 0x15e   :  { %v745_v50 = vmul.f32 %v800_v48, %v737_v49 }
 0x160   :  { %v747_v51 = vsel %vm746_vm2, %v745_v50, 0.0 }
 0x161   :  { %748 = vadd.xlane.f32.xlu1 %v747_v51 }
 0x1ee   :  { %v749_v52 = vpop.xlane.xlu1 %748 }
 0x1ef   :  { %v750_v53 = vmul.f32 0.125, %v749_v52 }
 0x1f1   :  { %v751_v54 = vsub.f32 %v737_v49, %v750_v53 }
 0x1f3   :  { %v752_v55 = vmul.f32 %v800_v48, %v751_v54 }
 0x1f5   :  { %v753_v56 = vmul.f32 %v752_v55, %v752_v55 }
 0x1f7   :  { %v754_v57 = vsel %vm746_vm2, %v753_v56, 0.0 }
 0x1f8   :  { %755 = vadd.xlane.f32.xlu0 %v754_v57 }
 0x285   :  { %v756_v58 = vpop.xlane.xlu0 %755 }
 0x286   :  { %v757_v59 = vmul.f32 0.125, %v756_v58 }
 0x288   :  { %v759_v60 = vadd.f32 1e-05, %v757_v59 }
 0x28a   :  { %877 = vrsqrt.f32 %v759_v60 }
 0x294   :  { %v878_v62 = vpop.eup %877 }
 0x295   :  { %v761_v63 = vmul.f32 %v878_v62, %v758_v61 }
 0x297   :  { %767 = vperm.xlu1 %876, %v761_v63   ;;  %v763_v1 = vmul.f32 %v761_v63, %v750_v53 }
 0x299   :  { %v764_v2 = vsub.f32 %v762_v0, %v763_v1 }
 0x29b   :  { %773 = vperm.xlu0 %875, %v764_v2  }
 0x316   :  { %v768_v3 = vpop.permute.xlu1 %767 }
 0x317   :  { %v770_v4 = vmul.f32 %v768_v3, %v737_v49 }
 0x31a   :  { %v774_v5 = vpop.permute.xlu0 %773 }
 0x31b   :  { %v776_v6 = vadd.f32 %v774_v5, %v770_v4 }
 0x31d   :  { %v777_v7 = vmax.f32 %v776_v6, 0.0 }
 0x31f   :  { %778 = vst.msk [vmem:[%s1015_s6] sm:$0xff] %vm746_vm2, %v777_v7 }

// kernel: hourglass_forward.12
= control target key start
LH: loop header
LB: loop body
LE: loop exit
PB: predicated region body
PF: predicated region fallthrough
CT: control target
= control target key end

     0   :  { %v39_v0 = vmov 0   ;;  %vm30_vm0 = vcmask 31744   ;;  %s78_s0 = inlined_call_operand.vmem [shape: f32[16,1], index: 0, kind: input, shape index: {}]   ;;  %s79_s2 = inlined_call_operand.vmem [shape: s32[1,4], index: 2, kind: input, shape index: {}]   ;;  %s80_s1 = inlined_call_operand.vmem [shape: f32[16,4], index: 1, kind: input, shape index: {}]   ;;  %s81_s3 = inlined_call_operand.vmem [shape: f32[16,4], index: 3, kind: output, shape index: {}]  }
   0x1   :  { %38 = vset.pattern.permute.xlu0 %v39_v0  ;;  %v16_v1 = vld [vmem:[%s78_s0] sm:$0xff]  ;;  %v17_v2 = vld [vmem:[%s78_s0 + $0x8] sm:$0xff] }
   0x2   :  { %20 = vperm.xlu0 %38, %v16_v1   ;;  %v14_v3 = vld [vmem:[%s80_s1] sm:$0xff]  ;;  %v15_v6 = vld [vmem:[%s80_s1 + $0x8] sm:$0xff] }
   0x6   :  { %25 = vperm.xlu0 %38, %v17_v2  }
  0x81   :  { %v21_v4 = vpop.permute.xlu0 %20 }
  0x82   :  { %v28_v5 = vadd.f32 %v21_v4, %v14_v3 }
  0x84   :  { %31 = vst.msk [vmem:[%s81_s3] sm:$0xff] %vm30_vm0, %v28_v5 }
  0x85   :  { %v26_v7 = vpop.permute.xlu0 %25 }
  0x86   :  { %v29_v8 = vadd.f32 %v26_v7, %v15_v6 }
  0x88   :  { %32 = vst.msk [vmem:[%s81_s3 + $0x8] sm:$0xff] %vm30_vm0, %v29_v8 }

// kernel: hourglass_forward.13
= control target key start
LH: loop header
LB: loop body
LE: loop exit
PB: predicated region body
PF: predicated region fallthrough
CT: control target
= control target key end

     0   :  { %v14_v0 = vlaneseq  ;;  %vm28_vm0 = vcmask 31744   ;;  %vm35_vm1 = vcmask 1043456   ;;  %v137_v4 = vmov 0.0   ;;  %s179_s2 = inlined_call_operand.vmem [shape: s32[1,16], index: 2, kind: input, shape index: {}]   ;;  %s180_s0 = inlined_call_operand.vmem [shape: f32[16,4], index: 0, kind: input, shape index: {}]   ;;  %s181_s1 = inlined_call_operand.vmem [shape: f32[16,16], index: 1, kind: input, shape index: {}]   ;;  %s182_s3 = inlined_call_operand.vmem [shape: f32[16,16], index: 3, kind: output, shape index: {}]  }
   0x1   :  { %v123_v1 = vld [vmem:[%s179_s2] ss:$0 sm:$0xff]  ;;  %v27_v6 = vld [vmem:[%s180_s0 + $0x8] sm:$0xff]  ;;  %vm116_vm3 = vcmask 130048  }
   0x2   :  { %v26_v2 = vld [vmem:[%s180_s0] sm:$0xff]  ;;  %v15_v3 = vshrl.u32 %v14_v0, 7  ;;  %v25_v7 = vld [vmem:[%s181_s1 + $0x8] sm:$0xff] }
   0x3   :  { %133 = vmatprep.mubr.msk.f32.mxu0 %vm28_vm0, %v26_v2  ;;  %v24_v8 = vld [vmem:[%s181_s1] sm:$0xff] }
   0x4   :  { %vm21_vm2 = vcmp.eq.s32.totalorder %v15_v3, %v123_v1 }
   0x5   :  { %v124_v5 = vsel %vm21_vm2, 1.0, %v137_v4 }
   0x6   :  { %131 = vmatprep.subr.msk.mxu0 %vm35_vm1, %v124_v5 }
   0x7   :  { %132 = vmatpush3.msk.msra.mxu0 %vm35_vm1, %v124_v5 }
   0x8   :  { %134 = vmatmul.mubr.msk.f32.vlgmr.msra.gmra.mrb[0].mxu0 %vm28_vm0, %v27_v6 }
  0xdb   :  { %v135_v9 = vpop.f32.mrb[0].mxu0 }
  0xdc   :  { %v115_v10 = vadd.f32 %v135_v9, %v25_v7  ;;  %v105_v11 = vpop.f32.mrb[1].mxu0 }
  0xdd   :  { %v114_v12 = vadd.f32 %v105_v11, %v24_v8 }
  0xde   :  { %118 = vst.msk [vmem:[%s182_s3 + $0x8] sm:$0xff] %vm116_vm3, %v115_v10 }
  0xdf   :  { %117 = vst.msk [vmem:[%s182_s3] sm:$0xff] %vm116_vm3, %v114_v12 }

// kernel: hourglass_forward.14
= control target key start
LH: loop header
LB: loop body
LE: loop exit
PB: predicated region body
PF: predicated region fallthrough
CT: control target
= control target key end

     0   :  { %v14_v0 = vlaneseq  ;;  %vm32_vm0 = vcmask 130048   ;;  %v146_v5 = vmov 1.0|1.0   ;;  %vm116_vm4 = vcmask 523264   ;;  %s188_s2 = inlined_call_operand.vmem [shape: s32[1,64], index: 2, kind: input, shape index: {}]   ;;  %s189_s0 = inlined_call_operand.vmem [shape: f32[16,16], index: 0, kind: input, shape index: {}]   ;;  %s190_s1 = inlined_call_operand.vmem [shape: f32[16,64], index: 1, kind: input, shape index: {}]   ;;  %s191_s3 = inlined_call_operand.vmem [shape: f32[16,64], index: 3, kind: output, shape index: {}]  }
   0x1   :  { %v123_v1 = vld [vmem:[%s188_s2] ss:$0 sm:$0xff]  ;;  %v31_v6 = vld [vmem:[%s189_s0 + $0x8] sm:$0xff] }
   0x2   :  { %v30_v2 = vld [vmem:[%s189_s0] sm:$0xff]  ;;  %v15_v3 = vshrl.u32 %v14_v0, 7  ;;  %v29_v7 = vld [vmem:[%s190_s1 + $0x8] sm:$0xff] }
   0x3   :  { %138 = vmatprep.mubr.msk.f32.mxu0 %vm32_vm0, %v30_v2  ;;  %v28_v8 = vld [vmem:[%s190_s1] sm:$0xff] }
   0x4   :  { %v16_v4 = vadd.s32 8, %v15_v3  ;;  %vm22_vm1 = vcmp.eq.s32.totalorder %v15_v3, %v123_v1 }
   0x6   :  { %vm23_vm2 = vcmp.eq.s32.totalorder %v16_v4, %v123_v1 }
   0x7   :  { %vm141_vm3 = vmpackc.low %vm23_vm2, %vm22_vm1 }
   0x8   :  { %142 = vmatprep.subr.msk.bf16.mxu0 %vm141_vm3, %v146_v5 }
   0x9   :  { %144 = vmatpush3.bf16.msk.msra.mxu0 %vm141_vm3, %v146_v5 }
   0xc   :  { %139 = vmatmul.mubr.msk.f32.vlgmr.msra.gmra.mrb[0].mxu0 %vm32_vm0, %v31_v6 }
  0xdf   :  { %v140_v9 = vpop.f32.mrb[0].mxu0 }
  0xe0   :  { %v115_v10 = vadd.f32 %v140_v9, %v29_v7  ;;  %v105_v11 = vpop.f32.mrb[1].mxu0 }
  0xe1   :  { %v114_v12 = vadd.f32 %v105_v11, %v28_v8 }
  0xe2   :  { %118 = vst.msk [vmem:[%s191_s3 + $0x8] sm:$0xff] %vm116_vm4, %v115_v10 }
  0xe3   :  { %117 = vst.msk [vmem:[%s191_s3] sm:$0xff] %vm116_vm4, %v114_v12 }

// kernel: hourglass_forward.15
= control target key start
LH: loop header
LB: loop body
LE: loop exit
PB: predicated region body
PF: predicated region fallthrough
CT: control target
= control target key end

     0   :  { %v14_v0 = vlaneseq  ;;  %v242_v1 = vmov 0.0   ;;  %v243_v13 = vmov 1.0|1.0   ;;  %s298_s2 = inlined_call_operand.vmem [shape: s32[1,256], index: 2, kind: input, shape index: {}]   ;;  %s299_s0 = inlined_call_operand.vmem [shape: f32[16,64], index: 0, kind: input, shape index: {}]   ;;  %s300_s1 = inlined_call_operand.vmem [shape: f32[16,256], index: 1, kind: input, shape index: {}]   ;;  %s301_s3 = inlined_call_operand.vmem [shape: f32[16,256], index: 3, kind: output, shape index: {}]  }
   0x1   :  { %157 = vmatprep.mubr.f32.mxu0 %v242_v1  ;;  %163 = vmatprep.mubr.f32.mxu1 %v242_v1  ;;  %v23_v3 = vld [vmem:[%s298_s2] sm:$0x3]  ;;  %v85_v17 = vld [vmem:[%s299_s0 + $0x8] sm:$0xff]  ;;  %v82_v19 = vld [vmem:[%s300_s1 + $0x10] sm:$0xff] }
   0x2   :  { %v15_v2 = vshrl.u32 %v14_v0, 7  ;;  %v84_v16 = vld [vmem:[%s299_s0] sm:$0xff]  ;;  %v81_v20 = vld [vmem:[%s300_s1 + $0x8] sm:$0xff]  ;;  %v83_v21 = vld [vmem:[%s300_s1 + $0x18] sm:$0xff] }
   0x3   :  { %v80_v18 = vld [vmem:[%s300_s1] sm:$0xff] }
   0x4   :  { %v16_v4 = vadd.s32 8, %v15_v2  ;;  %v30_v5 = vsub.s32 1, %v15_v2  ;;  %v26_v6 = vsub.s32 0, %v15_v2  ;;  %v17_v7 = vadd.s32 16, %v15_v2 }
   0x5   :  { %v18_v8 = vadd.s32 24, %v15_v2  ;;  %v19_v11 = vadd.s32 32, %v15_v2  ;;  %v20_v12 = vadd.s32 40, %v15_v2  ;;  %v21_v14 = vadd.s32 48, %v15_v2 }
   0x6   :  { %v31_v9 = vrot.slane %v23_v3, %v30_v5  ;;  %v27_v10 = vrot.slane %v23_v3, %v26_v6  ;;  %v22_v15 = vadd.s32 56, %v15_v2 }
   0x8   :  { %vm33_vm0 = vcmp.eq.s32.totalorder %v15_v2, %v31_v9  ;;  %vm35_vm1 = vcmp.eq.s32.totalorder %v16_v4, %v31_v9  ;;  %vm32_vm2 = vcmp.eq.s32.totalorder %v15_v2, %v27_v10  ;;  %vm34_vm3 = vcmp.eq.s32.totalorder %v16_v4, %v27_v10 }
   0x9   :  { %vm216_vm4 = vmpackc.low %vm35_vm1, %vm33_vm0  ;;  %vm37_vm5 = vcmp.eq.s32.totalorder %v17_v7, %v31_v9  ;;  %vm39_vm6 = vcmp.eq.s32.totalorder %v18_v8, %v31_v9  ;;  %vm36_vm7 = vcmp.eq.s32.totalorder %v17_v7, %v27_v10  ;;  %vm38_vm8 = vcmp.eq.s32.totalorder %v18_v8, %v27_v10 }
   0xa   :  { %217 = vmatprep.subr.msk.bf16.mxu0 %vm216_vm4, %v243_v13  ;;  %232 = vmatprep.subr.msk.bf16.mxu1 %vm216_vm4, %v243_v13  ;;  %vm218_vm9 = vmpackc.low %vm34_vm3, %vm32_vm2  ;;  %vm41_vm10 = vcmp.eq.s32.totalorder %v19_v11, %v31_v9  ;;  %vm43_vm11 = vcmp.eq.s32.totalorder %v20_v12, %v31_v9  ;;  %vm40_vm15 = vcmp.eq.s32.totalorder %v19_v11, %v27_v10 }
   0xb   :  { %219 = vmatpush1.bf16.msk.msra.mxu0 %vm218_vm9, %v243_v13  ;;  %236 = vmatpush1.bf16.msk.msra.mxu1 %vm218_vm9, %v243_v13  ;;  %vm220_vm12 = vmpackc.low %vm39_vm6, %vm37_vm5  ;;  %vm42_vm0 = vcmp.eq.s32.totalorder %v20_v12, %v27_v10  ;;  %vm45_vm1 = vcmp.eq.s32.totalorder %v21_v14, %v31_v9  ;;  %vm47_vm4 = vcmp.eq.s32.totalorder %v22_v15, %v31_v9 }
   0xc   :  { %221 = vmatprep.subr.msk.bf16.mxu0 %vm220_vm12, %v243_v13  ;;  %233 = vmatprep.subr.msk.bf16.mxu1 %vm220_vm12, %v243_v13  ;;  %vm222_vm13 = vmpackc.low %vm38_vm8, %vm36_vm7  ;;  %vm44_vm9 = vcmp.eq.s32.totalorder %v21_v14, %v27_v10  ;;  %vm46_vm5 = vcmp.eq.s32.totalorder %v22_v15, %v27_v10  ;;  %vm86_vm7 = vcmask 523264  }
   0xd   :  { %vm224_vm14 = vmpackc.low %vm43_vm11, %vm41_vm10 }
   0xe   :  { %vm226_vm2 = vmpackc.low %vm42_vm0, %vm40_vm15 }
   0xf   :  { %223 = vmatpush1.bf16.msk.msra.mxu0 %vm222_vm13, %v243_v13  ;;  %237 = vmatpush1.bf16.msk.msra.mxu1 %vm222_vm13, %v243_v13  ;;  %vm228_vm3 = vmpackc.low %vm47_vm4, %vm45_vm1 }
  0x10   :  { %225 = vmatprep.subr.msk.bf16.mxu0 %vm224_vm14, %v243_v13  ;;  %234 = vmatprep.subr.msk.bf16.mxu1 %vm224_vm14, %v243_v13  ;;  %vm230_vm6 = vmpackc.low %vm46_vm5, %vm44_vm9 }
  0x13   :  { %227 = vmatpush1.bf16.msk.msra.mxu0 %vm226_vm2, %v243_v13  ;;  %238 = vmatpush1.bf16.msk.msra.mxu1 %vm226_vm2, %v243_v13 }
  0x14   :  { %229 = vmatprep.subr.msk.bf16.mxu0 %vm228_vm3, %v243_v13  ;;  %235 = vmatprep.subr.msk.bf16.mxu1 %vm228_vm3, %v243_v13 }
  0x17   :  { %231 = vmatpush1.bf16.msk.msra.mxu0 %vm230_vm6, %v243_v13  ;;  %239 = vmatpush1.bf16.msk.msra.mxu1 %vm230_vm6, %v243_v13 }
  0x1a   :  { %214 = vmatmul.mubr.msk.f32.vlgmr.msra.gmra.mrb[0].mxu0 %vm86_vm7, %v84_v16  ;;  %215 = vmatmul.mubr.msk.f32.vlgmr.msra.gmra.mrb[0].mxu1 %vm86_vm7, %v85_v17 }
  0xed   :  { %v159_v22 = vpop.f32.mrb[0].mxu0  ;;  %v165_v23 = vpop.f32.mrb[0].mxu1 }
  0xee   :  { %v170_v24 = vadd.f32 %v159_v22, %v80_v18  ;;  %v172_v25 = vadd.f32 %v165_v23, %v82_v19  ;;  %v161_v26 = vpop.f32.mrb[1].mxu0  ;;  %v167_v27 = vpop.f32.mrb[1].mxu1 }
  0xef   :  { %v171_v28 = vadd.f32 %v161_v26, %v81_v20  ;;  %v173_v29 = vadd.f32 %v167_v27, %v83_v21 }
  0xf0   :  { %174 = vst [vmem:[%s301_s3] sm:$0xff] %v170_v24  ;;  %176 = vst [vmem:[%s301_s3 + $0x10] sm:$0xff] %v172_v25 }
  0xf1   :  { %175 = vst [vmem:[%s301_s3 + $0x8] sm:$0xff] %v171_v28  ;;  %177 = vst [vmem:[%s301_s3 + $0x18] sm:$0xff] %v173_v29 }

</bundles_post_ra>
